<compile_context>
chip_gen: v7x
topology: tpu7x:2x2x1
jax: 0.10.0
libtpu: 0.0.40
codegen_flags: <defaults>
</compile_context>

<pallas_src>
import functools

import jax
import jax.numpy as jnp
import numpy as np
from jax.experimental import pallas as pl
from jax.experimental.pallas import tpu as pltpu

NEG_SLOPE = 0.2   # LeakyReLU negative slope
RES_SCALE = 0.2   # residual scaling
LANE = 128


def _round_up(v, m):
    return (v + m - 1) // m * m


# ------------------------------- Pallas kernel -------------------------------

def _resblock_kernel(x_ref, w1_ref, b1_ref, w2_ref, b2_ref, o_ref, pad_ref,
                     *, NB, W, HW, HWp, PAD, STRIDE):
    """Fused ResBlock, channel-major flattened-spatial layout.

      x_ref / o_ref : (NB, Cp, HWp)        activations, lanes = flattened H*W
      w*_ref        : (Cp, 9*Cp)  bf16     im2col-stacked 3x3 weights (tap-major)
      b*_ref        : (Cp, 1)     f32
      pad_ref       : (Cp, NB*STRIDE) f32  scratch, per-image zero halo
                      (image b interior lives at [b*STRIDE+PAD, b*STRIDE+PAD+HWp))
    """
    # Flattened-position helpers (built once, shared by both convs).
    pos = jax.lax.broadcasted_iota(jnp.int32, (1, HWp), 1)
    col = pos % W
    m_left = (col > 0).astype(jnp.float32)         # valid positions for dx = -1
    m_right = (col < (W - 1)).astype(jnp.float32)  # valid positions for dx = +1
    in_img = (pos < HW).astype(jnp.float32) if HWp != HW else None

    # Zero the halo once for the whole grid: the scratch persists across grid
    # steps and only interior lanes are ever stored below, so the halos stay 0.
    @pl.when(pl.program_id(0) == 0)
    def _init_halo():
        pad_ref[...] = jnp.zeros_like(pad_ref)

    def conv3x3(imgs, w_ref, b_ref):
        # imgs: list of NB arrays (Cp, HWp) f32  ->  conv3x3 + b : (Cp, NB*HWp) f32
        for b in range(NB):
            vi = imgs[b] if in_img is None else imgs[b] * in_img
            lo = b * STRIDE + PAD
            pad_ref[:, lo:lo + HWp] = vi            # lane-aligned interior store
        tap_rows = []
        for t in range(9):                          # tap = ky*3 + kx
            dy, dx = t // 3 - 1, t % 3 - 1
            d = dy * W + dx
            slabs = []
            for b in range(NB):
                lo = b * STRIDE + PAD + d
                s = pad_ref[:, lo:lo + HWp]         # static view, no full-row load
                if dx == -1:
                    s = s * m_left
                elif dx == 1:
                    s = s * m_right
                slabs.append(s.astype(jnp.bfloat16))
            tap_rows.append(slabs[0] if NB == 1
                            else jnp.concatenate(slabs, axis=1))
        stack = jnp.concatenate(tap_rows, axis=0)   # (9*Cp, NB*HWp) bf16 im2col
        y = jnp.dot(w_ref[...], stack,              # bf16 x bf16 -> f32 acc (MXU)
                    preferred_element_type=jnp.float32)
        return y + b_ref[...]

    x_imgs = [x_ref[b].astype(jnp.float32) for b in range(NB)]   # (Cp, HWp) each
    t1 = conv3x3(x_imgs, w1_ref, b1_ref)                         # (Cp, NB*HWp)
    t1 = jnp.where(t1 >= 0, t1, NEG_SLOPE * t1)                  # LeakyReLU(0.2)
    t1_imgs = [t1[:, b * HWp:(b + 1) * HWp] for b in range(NB)]
    t2 = conv3x3(t1_imgs, w2_ref, b2_ref)                        # (Cp, NB*HWp)
    for b in range(NB):
        o_ref[b] = (x_imgs[b]
                    + RES_SCALE * t2[:, b * HWp:(b + 1) * HWp]).astype(o_ref.dtype)


# --------------------------------- wrapper -----------------------------------

def resblock_forward(x, w1, b1, w2, b2, *, nb=None):
    """ResBlock forward.  x: (N,C,H,W) NCHW, w: (C,C,3,3) OIHW, b: (C,)."""
    N, C, H, W = x.shape
    HW = H * W
    Cp = _round_up(max(C, 8), 8)                 # sublane-align channels
    HWp = _round_up(max(HW, LANE), LANE)         # lane-align flattened spatial
    PAD = _round_up(W + 1, LANE)                 # zero halo (covers +/- one row)
    STRIDE = PAD + HWp + PAD                     # per-image slot in pad scratch

    if nb is None:
        # Images per grid step: widen the matmul RHS / output stores to ~1024
        # lanes to amortize per-step overhead and the M=32 weight push.
        nb = max(1, min(N, max(1, 1024 // HWp)))
    Np = _round_up(N, nb)

    # Channel-major, flattened spatial: pure reshape (+ zero pad if unaligned).
    xf = jnp.pad(x.reshape(N, C, HW),
                 ((0, Np - N), (0, Cp - C), (0, HWp - HW)))

    def prep_w(w):
        wp = jnp.pad(w, ((0, Cp - C), (0, Cp - C), (0, 0), (0, 0)))
        # OIHW -> (Cout, ky, kx, Cin) -> (Cout, 9*Cin); column = tap*Cin + cin
        return (jnp.transpose(wp, (0, 2, 3, 1))
                .reshape(Cp, 9 * Cp).astype(jnp.bfloat16))

    def prep_b(b):
        return jnp.pad(b, (0, Cp - C)).reshape(Cp, 1).astype(jnp.float32)

    kern = functools.partial(_resblock_kernel, NB=nb, W=W, HW=HW, HWp=HWp,
                             PAD=PAD, STRIDE=STRIDE)
    out = pl.pallas_call(
        kern,
        out_shape=jax.ShapeDtypeStruct((Np, Cp, HWp), x.dtype),
        grid=(Np // nb,),
        in_specs=[
            pl.BlockSpec((nb, Cp, HWp), lambda n: (n, 0, 0)),
            pl.BlockSpec((Cp, 9 * Cp), lambda n: (0, 0)),
            pl.BlockSpec((Cp, 1), lambda n: (0, 0)),
            pl.BlockSpec((Cp, 9 * Cp), lambda n: (0, 0)),
            pl.BlockSpec((Cp, 1), lambda n: (0, 0)),
        ],
        out_specs=pl.BlockSpec((nb, Cp, HWp), lambda n: (n, 0, 0)),
        scratch_shapes=[pltpu.VMEM((Cp, nb * STRIDE), jnp.float32)],
        compiler_params=pltpu.CompilerParams(
            dimension_semantics=("parallel",)),
    )(xf, prep_w(w1), prep_b(b1), prep_w(w2), prep_b(b2))

    return out[:N, :C, :HW].reshape(N, C, H, W)


# ---------------------------- pure-JAX reference -----------------------------

def _leaky(v):
    return jnp.where(v >= 0, v, NEG_SLOPE * v)


def resblock_reference(x, w1, b1, w2, b2):
    def conv(v, w, b):
        y = jax.lax.conv_general_dilated(
            v, w, window_strides=(1, 1), padding="SAME",
            dimension_numbers=("NCHW", "OIHW", "NCHW"))
        return y + b[None, :, None, None]
    return x + RES_SCALE * conv(_leaky(conv(x, w1, b1)), w2, b2)


# ------------------------------------ main ------------------------------------

if __name__ == "__main__":
    key = jax.random.PRNGKey(0)
    kx, k1, k2, k3, k4 = jax.random.split(key, 5)

    # Small shapes consistent with ResBlock(channels=32): batch=2, 16x16.
    N, C, H, W = 2, 32, 16, 16
    fan_in = C * 9
    x = jax.random.normal(kx, (N, C, H, W), jnp.float32)
    w1 = jax.random.normal(k1, (C, C, 3, 3), jnp.float32) / np.sqrt(fan_in)
    b1 = 0.01 * jax.random.normal(k2, (C,), jnp.float32)
    w2 = jax.random.normal(k3, (C, C, 3, 3), jnp.float32) / np.sqrt(fan_in)
    b2 = 0.01 * jax.random.normal(k4, (C,), jnp.float32)

    fwd = jax.jit(resblock_forward)
    out = jax.block_until_ready(fwd(x, w1, b1, w2, b2))
    assert out.shape == (N, C, H, W), out.shape

    ref = jax.block_until_ready(jax.jit(resblock_reference)(x, w1, b1, w2, b2))
    # bf16 MXU operands with f32 accumulation: slightly looser than pure f32.
    np.testing.assert_allclose(np.asarray(out), np.asarray(ref),
                               rtol=5e-3, atol=2e-2)

    print("KERNEL_OK")
</pallas_src>

<mosaic_0001>
module attributes {stable_mosaic.version = 11 : i64} {
  func.func @_resblock_kernel(%arg0: i32, %arg1: memref<2x32x256xf32, #tpu.memory_space<vmem>>, %arg2: memref<32x288xbf16, #tpu.memory_space<vmem>>, %arg3: memref<32x1xf32, #tpu.memory_space<vmem>>, %arg4: memref<32x288xbf16, #tpu.memory_space<vmem>>, %arg5: memref<32x1xf32, #tpu.memory_space<vmem>>, %arg6: memref<2x32x256xf32, #tpu.memory_space<vmem>>, %arg7: memref<32x1024xf32, #tpu.memory_space<vmem>>) attributes {dimension_semantics = [#tpu.dimension_semantics<parallel>], iteration_bounds = array<i64: 1>, scalar_prefetch = 0 : i64, scratch_operands = 1 : i64, tpu.core_type = #tpu.core_type<tc>, window_params = [{transform_indices = @transform_0, window_bounds = array<i64: 2, 32, 256>}, {pipeline_mode = #tpu.pipeline_mode<synchronous>, transform_indices = @transform_1, window_bounds = array<i64: 32, 288>}, {pipeline_mode = #tpu.pipeline_mode<synchronous>, transform_indices = @transform_2, window_bounds = array<i64: 32, 1>}, {pipeline_mode = #tpu.pipeline_mode<synchronous>, transform_indices = @transform_3, window_bounds = array<i64: 32, 288>}, {pipeline_mode = #tpu.pipeline_mode<synchronous>, transform_indices = @transform_4, window_bounds = array<i64: 32, 1>}, {transform_indices = @transform_5, window_bounds = array<i64: 2, 32, 256>}]} {
    %0 = tpu.iota {dimensions = array<i32: 1>} : vector<1x256xi32>
    %c16_i32 = arith.constant 16 : i32
    %c0_i32 = arith.constant 0 : i32
    %1 = arith.cmpi eq, %c16_i32, %c0_i32 : i32
    %c1_i32 = arith.constant 1 : i32
    %2 = arith.select %1, %c1_i32, %c16_i32 : i32
    %3 = vector.broadcast %2 : i32 to vector<1x256xi32>
    %4 = arith.remsi %0, %3 : vector<1x256xi32>
    %c0_i32_0 = arith.constant 0 : i32
    %5 = vector.broadcast %c0_i32_0 : i32 to vector<1x256xi32>
    %6 = arith.cmpi ne, %4, %5 : vector<1x256xi32>
    %c0_i32_1 = arith.constant 0 : i32
    %7 = vector.broadcast %c0_i32_1 : i32 to vector<1x256xi32>
    %8 = arith.cmpi slt, %4, %7 : vector<1x256xi32>
    %c0_i32_2 = arith.constant 0 : i32
    %9 = arith.cmpi slt, %2, %c0_i32_2 : i32
    %10 = vector.broadcast %9 : i1 to vector<1x256xi1>
    %11 = vector.broadcast %10 : vector<1x256xi1> to vector<1x256xi1>
    %12 = arith.xori %8, %11 : vector<1x256xi1>
    %13 = arith.andi %12, %6 : vector<1x256xi1>
    %14 = vector.broadcast %2 : i32 to vector<1x256xi32>
    %15 = arith.addi %4, %14 : vector<1x256xi32>
    %16 = arith.select %13, %15, %4 : vector<1x256xi1>, vector<1x256xi32>
    %c0_i32_3 = arith.constant 0 : i32
    %17 = vector.broadcast %c0_i32_3 : i32 to vector<1x256xi32>
    %18 = arith.cmpi sgt, %16, %17 : vector<1x256xi32>
    %19 = arith.extui %18 : vector<1x256xi1> to vector<1x256xi32>
    %20 = arith.sitofp %19 : vector<1x256xi32> to vector<1x256xf32>
    %c15_i32 = arith.constant 15 : i32
    %21 = vector.broadcast %c15_i32 : i32 to vector<1x256xi32>
    %22 = arith.cmpi slt, %16, %21 : vector<1x256xi32>
    %23 = arith.extui %22 : vector<1x256xi1> to vector<1x256xi32>
    %24 = arith.sitofp %23 : vector<1x256xi32> to vector<1x256xf32>
    %c0_i32_4 = arith.constant 0 : i32
    %25 = arith.cmpi eq, %arg0, %c0_i32_4 : i32
    %26 = arith.extui %25 : i1 to i32
    %c0_i32_5 = arith.constant 0 : i32
    %27 = arith.cmpi ne, %26, %c0_i32_5 : i32
    scf.if %27 {
      %cst_91 = arith.constant 0.000000e+00 : f32
      %207 = vector.broadcast %cst_91 : f32 to vector<32x1024xf32>
      %c0_92 = arith.constant 0 : index
      %c0_93 = arith.constant 0 : index
      %208 = vector.load %arg7[%c0_92, %c0_93] : memref<32x1024xf32, #tpu.memory_space<vmem>>, vector<32x1024xf32>
      tpu.vector_store %arg7[%c0_92, %c0_93], %207 {strides = array<i32>} : memref<32x1024xf32, #tpu.memory_space<vmem>>, vector<32x1024xf32>,
    } else {
    }
    %c0 = arith.constant 0 : index
    %c0_6 = arith.constant 0 : index
    %c0_7 = arith.constant 0 : index
    %28 = vector.load %arg1[%c0, %c0_6, %c0_7] : memref<2x32x256xf32, #tpu.memory_space<vmem>>, vector<1x32x256xf32>
    %29 = vector.shape_cast %28 : vector<1x32x256xf32> to vector<32x256xf32>
    %c1 = arith.constant 1 : index
    %c0_8 = arith.constant 0 : index
    %c0_9 = arith.constant 0 : index
    %30 = vector.load %arg1[%c1, %c0_8, %c0_9] : memref<2x32x256xf32, #tpu.memory_space<vmem>>, vector<1x32x256xf32>
    %31 = vector.shape_cast %30 : vector<1x32x256xf32> to vector<32x256xf32>
    %c0_10 = arith.constant 0 : index
    %c128 = arith.constant 128 : index
    %32 = vector.load %arg7[%c0_10, %c128] : memref<32x1024xf32, #tpu.memory_space<vmem>>, vector<32x256xf32>
    tpu.vector_store %arg7[%c0_10, %c128], %29 {strides = array<i32>} : memref<32x1024xf32, #tpu.memory_space<vmem>>, vector<32x256xf32>,
    %c0_11 = arith.constant 0 : index
    %c640 = arith.constant 640 : index
    %33 = vector.load %arg7[%c0_11, %c640] : memref<32x1024xf32, #tpu.memory_space<vmem>>, vector<32x256xf32>
    tpu.vector_store %arg7[%c0_11, %c640], %31 {strides = array<i32>} : memref<32x1024xf32, #tpu.memory_space<vmem>>, vector<32x256xf32>,
    %c0_12 = arith.constant 0 : index
    %c111 = arith.constant 111 : index
    %34 = vector.load %arg7[%c0_12, %c111] : memref<32x1024xf32, #tpu.memory_space<vmem>>, vector<32x256xf32>
    %35 = vector.broadcast %20 : vector<1x256xf32> to vector<32x256xf32>
    %36 = arith.mulf %34, %35 : vector<32x256xf32>
    %37 = arith.truncf %36 : vector<32x256xf32> to vector<32x256xbf16>
    %c0_13 = arith.constant 0 : index
    %c623 = arith.constant 623 : index
    %38 = vector.load %arg7[%c0_13, %c623] : memref<32x1024xf32, #tpu.memory_space<vmem>>, vector<32x256xf32>
    %39 = vector.broadcast %20 : vector<1x256xf32> to vector<32x256xf32>
    %40 = arith.mulf %38, %39 : vector<32x256xf32>
    %41 = arith.truncf %40 : vector<32x256xf32> to vector<32x256xbf16>
    %42 = tpu.concatenate %37, %41 in 1 : vector<32x256xbf16>, vector<32x256xbf16> -> vector<32x512xbf16>
    %c0_14 = arith.constant 0 : index
    %c112 = arith.constant 112 : index
    %43 = vector.load %arg7[%c0_14, %c112] : memref<32x1024xf32, #tpu.memory_space<vmem>>, vector<32x256xf32>
    %44 = arith.truncf %43 : vector<32x256xf32> to vector<32x256xbf16>
    %c0_15 = arith.constant 0 : index
    %c624 = arith.constant 624 : index
    %45 = vector.load %arg7[%c0_15, %c624] : memref<32x1024xf32, #tpu.memory_space<vmem>>, vector<32x256xf32>
    %46 = arith.truncf %45 : vector<32x256xf32> to vector<32x256xbf16>
    %47 = tpu.concatenate %44, %46 in 1 : vector<32x256xbf16>, vector<32x256xbf16> -> vector<32x512xbf16>
    %c0_16 = arith.constant 0 : index
    %c113 = arith.constant 113 : index
    %48 = vector.load %arg7[%c0_16, %c113] : memref<32x1024xf32, #tpu.memory_space<vmem>>, vector<32x256xf32>
    %49 = vector.broadcast %24 : vector<1x256xf32> to vector<32x256xf32>
    %50 = arith.mulf %48, %49 : vector<32x256xf32>
    %51 = arith.truncf %50 : vector<32x256xf32> to vector<32x256xbf16>
    %c0_17 = arith.constant 0 : index
    %c625 = arith.constant 625 : index
    %52 = vector.load %arg7[%c0_17, %c625] : memref<32x1024xf32, #tpu.memory_space<vmem>>, vector<32x256xf32>
    %53 = vector.broadcast %24 : vector<1x256xf32> to vector<32x256xf32>
    %54 = arith.mulf %52, %53 : vector<32x256xf32>
    %55 = arith.truncf %54 : vector<32x256xf32> to vector<32x256xbf16>
    %56 = tpu.concatenate %51, %55 in 1 : vector<32x256xbf16>, vector<32x256xbf16> -> vector<32x512xbf16>
    %c0_18 = arith.constant 0 : index
    %c127 = arith.constant 127 : index
    %57 = vector.load %arg7[%c0_18, %c127] : memref<32x1024xf32, #tpu.memory_space<vmem>>, vector<32x256xf32>
    %58 = vector.broadcast %20 : vector<1x256xf32> to vector<32x256xf32>
    %59 = arith.mulf %57, %58 : vector<32x256xf32>
    %60 = arith.truncf %59 : vector<32x256xf32> to vector<32x256xbf16>
    %c0_19 = arith.constant 0 : index
    %c639 = arith.constant 639 : index
    %61 = vector.load %arg7[%c0_19, %c639] : memref<32x1024xf32, #tpu.memory_space<vmem>>, vector<32x256xf32>
    %62 = vector.broadcast %20 : vector<1x256xf32> to vector<32x256xf32>
    %63 = arith.mulf %61, %62 : vector<32x256xf32>
    %64 = arith.truncf %63 : vector<32x256xf32> to vector<32x256xbf16>
    %65 = tpu.concatenate %60, %64 in 1 : vector<32x256xbf16>, vector<32x256xbf16> -> vector<32x512xbf16>
    %c0_20 = arith.constant 0 : index
    %c128_21 = arith.constant 128 : index
    %66 = vector.load %arg7[%c0_20, %c128_21] : memref<32x1024xf32, #tpu.memory_space<vmem>>, vector<32x256xf32>
    %67 = arith.truncf %66 : vector<32x256xf32> to vector<32x256xbf16>
    %c0_22 = arith.constant 0 : index
    %c640_23 = arith.constant 640 : index
    %68 = vector.load %arg7[%c0_22, %c640_23] : memref<32x1024xf32, #tpu.memory_space<vmem>>, vector<32x256xf32>
    %69 = arith.truncf %68 : vector<32x256xf32> to vector<32x256xbf16>
    %70 = tpu.concatenate %67, %69 in 1 : vector<32x256xbf16>, vector<32x256xbf16> -> vector<32x512xbf16>
    %c0_24 = arith.constant 0 : index
    %c129 = arith.constant 129 : index
    %71 = vector.load %arg7[%c0_24, %c129] : memref<32x1024xf32, #tpu.memory_space<vmem>>, vector<32x256xf32>
    %72 = vector.broadcast %24 : vector<1x256xf32> to vector<32x256xf32>
    %73 = arith.mulf %71, %72 : vector<32x256xf32>
    %74 = arith.truncf %73 : vector<32x256xf32> to vector<32x256xbf16>
    %c0_25 = arith.constant 0 : index
    %c641 = arith.constant 641 : index
    %75 = vector.load %arg7[%c0_25, %c641] : memref<32x1024xf32, #tpu.memory_space<vmem>>, vector<32x256xf32>
    %76 = vector.broadcast %24 : vector<1x256xf32> to vector<32x256xf32>
    %77 = arith.mulf %75, %76 : vector<32x256xf32>
    %78 = arith.truncf %77 : vector<32x256xf32> to vector<32x256xbf16>
    %79 = tpu.concatenate %74, %78 in 1 : vector<32x256xbf16>, vector<32x256xbf16> -> vector<32x512xbf16>
    %c0_26 = arith.constant 0 : index
    %c143 = arith.constant 143 : index
    %80 = vector.load %arg7[%c0_26, %c143] : memref<32x1024xf32, #tpu.memory_space<vmem>>, vector<32x256xf32>
    %81 = vector.broadcast %20 : vector<1x256xf32> to vector<32x256xf32>
    %82 = arith.mulf %80, %81 : vector<32x256xf32>
    %83 = arith.truncf %82 : vector<32x256xf32> to vector<32x256xbf16>
    %c0_27 = arith.constant 0 : index
    %c655 = arith.constant 655 : index
    %84 = vector.load %arg7[%c0_27, %c655] : memref<32x1024xf32, #tpu.memory_space<vmem>>, vector<32x256xf32>
    %85 = vector.broadcast %20 : vector<1x256xf32> to vector<32x256xf32>
    %86 = arith.mulf %84, %85 : vector<32x256xf32>
    %87 = arith.truncf %86 : vector<32x256xf32> to vector<32x256xbf16>
    %88 = tpu.concatenate %83, %87 in 1 : vector<32x256xbf16>, vector<32x256xbf16> -> vector<32x512xbf16>
    %c0_28 = arith.constant 0 : index
    %c144 = arith.constant 144 : index
    %89 = vector.load %arg7[%c0_28, %c144] : memref<32x1024xf32, #tpu.memory_space<vmem>>, vector<32x256xf32>
    %90 = arith.truncf %89 : vector<32x256xf32> to vector<32x256xbf16>
    %c0_29 = arith.constant 0 : index
    %c656 = arith.constant 656 : index
    %91 = vector.load %arg7[%c0_29, %c656] : memref<32x1024xf32, #tpu.memory_space<vmem>>, vector<32x256xf32>
    %92 = arith.truncf %91 : vector<32x256xf32> to vector<32x256xbf16>
    %93 = tpu.concatenate %90, %92 in 1 : vector<32x256xbf16>, vector<32x256xbf16> -> vector<32x512xbf16>
    %c0_30 = arith.constant 0 : index
    %c145 = arith.constant 145 : index
    %94 = vector.load %arg7[%c0_30, %c145] : memref<32x1024xf32, #tpu.memory_space<vmem>>, vector<32x256xf32>
    %95 = vector.broadcast %24 : vector<1x256xf32> to vector<32x256xf32>
    %96 = arith.mulf %94, %95 : vector<32x256xf32>
    %97 = arith.truncf %96 : vector<32x256xf32> to vector<32x256xbf16>
    %c0_31 = arith.constant 0 : index
    %c657 = arith.constant 657 : index
    %98 = vector.load %arg7[%c0_31, %c657] : memref<32x1024xf32, #tpu.memory_space<vmem>>, vector<32x256xf32>
    %99 = vector.broadcast %24 : vector<1x256xf32> to vector<32x256xf32>
    %100 = arith.mulf %98, %99 : vector<32x256xf32>
    %101 = arith.truncf %100 : vector<32x256xf32> to vector<32x256xbf16>
    %102 = tpu.concatenate %97, %101 in 1 : vector<32x256xbf16>, vector<32x256xbf16> -> vector<32x512xbf16>
    %103 = tpu.concatenate %42, %47, %56, %65, %70, %79, %88, %93, %102 in 0 : vector<32x512xbf16>, vector<32x512xbf16>, vector<32x512xbf16>, vector<32x512xbf16>, vector<32x512xbf16>, vector<32x512xbf16>, vector<32x512xbf16>, vector<32x512xbf16>, vector<32x512xbf16> -> vector<288x512xbf16>
    %c0_32 = arith.constant 0 : index
    %c0_33 = arith.constant 0 : index
    %104 = vector.load %arg2[%c0_32, %c0_33] : memref<32x288xbf16, #tpu.memory_space<vmem>>, vector<32x288xbf16>
    %cst = arith.constant dense<0.000000e+00> : vector<32x512xf32>
    %105 = tpu.matmul %104, %103, %cst {dimension_numbers = #tpu.dot_dimension_numbers<[1], [0], [0], [1], [0, 0, 1, 1], [], []>} : vector<32x288xbf16>, vector<288x512xbf16>, vector<32x512xf32> -> vector<32x512xf32>
    %c0_34 = arith.constant 0 : index
    %c0_35 = arith.constant 0 : index
    %106 = vector.load %arg3[%c0_34, %c0_35] : memref<32x1xf32, #tpu.memory_space<vmem>>, vector<32x1xf32>
    %107 = vector.broadcast %106 : vector<32x1xf32> to vector<32x512xf32>
    %108 = arith.addf %105, %107 : vector<32x512xf32>
    %cst_36 = arith.constant 0.000000e+00 : f32
    %109 = vector.broadcast %cst_36 : f32 to vector<32x512xf32>
    %110 = arith.cmpf oge, %108, %109 : vector<32x512xf32>
    %cst_37 = arith.constant 2.000000e-01 : f32
    %111 = vector.broadcast %cst_37 : f32 to vector<32x512xf32>
    %112 = arith.mulf %111, %108 : vector<32x512xf32>
    %113 = arith.select %110, %108, %112 : vector<32x512xi1>, vector<32x512xf32>
    %114 = vector.extract_strided_slice %113 {offsets = [0, 0], sizes = [32, 256], strides = [1, 1]} : vector<32x512xf32> to vector<32x256xf32>
    %115 = vector.extract_strided_slice %113 {offsets = [0, 256], sizes = [32, 256], strides = [1, 1]} : vector<32x512xf32> to vector<32x256xf32>
    %c0_38 = arith.constant 0 : index
    %c128_39 = arith.constant 128 : index
    %116 = vector.load %arg7[%c0_38, %c128_39] : memref<32x1024xf32, #tpu.memory_space<vmem>>, vector<32x256xf32>
    tpu.vector_store %arg7[%c0_38, %c128_39], %114 {strides = array<i32>} : memref<32x1024xf32, #tpu.memory_space<vmem>>, vector<32x256xf32>,
    %c0_40 = arith.constant 0 : index
    %c640_41 = arith.constant 640 : index
    %117 = vector.load %arg7[%c0_40, %c640_41] : memref<32x1024xf32, #tpu.memory_space<vmem>>, vector<32x256xf32>
    tpu.vector_store %arg7[%c0_40, %c640_41], %115 {strides = array<i32>} : memref<32x1024xf32, #tpu.memory_space<vmem>>, vector<32x256xf32>,
    %c0_42 = arith.constant 0 : index
    %c111_43 = arith.constant 111 : index
    %118 = vector.load %arg7[%c0_42, %c111_43] : memref<32x1024xf32, #tpu.memory_space<vmem>>, vector<32x256xf32>
    %119 = vector.broadcast %20 : vector<1x256xf32> to vector<32x256xf32>
    %120 = arith.mulf %118, %119 : vector<32x256xf32>
    %121 = arith.truncf %120 : vector<32x256xf32> to vector<32x256xbf16>
    %c0_44 = arith.constant 0 : index
    %c623_45 = arith.constant 623 : index
    %122 = vector.load %arg7[%c0_44, %c623_45] : memref<32x1024xf32, #tpu.memory_space<vmem>>, vector<32x256xf32>
    %123 = vector.broadcast %20 : vector<1x256xf32> to vector<32x256xf32>
    %124 = arith.mulf %122, %123 : vector<32x256xf32>
    %125 = arith.truncf %124 : vector<32x256xf32> to vector<32x256xbf16>
    %126 = tpu.concatenate %121, %125 in 1 : vector<32x256xbf16>, vector<32x256xbf16> -> vector<32x512xbf16>
    %c0_46 = arith.constant 0 : index
    %c112_47 = arith.constant 112 : index
    %127 = vector.load %arg7[%c0_46, %c112_47] : memref<32x1024xf32, #tpu.memory_space<vmem>>, vector<32x256xf32>
    %128 = arith.truncf %127 : vector<32x256xf32> to vector<32x256xbf16>
    %c0_48 = arith.constant 0 : index
    %c624_49 = arith.constant 624 : index
    %129 = vector.load %arg7[%c0_48, %c624_49] : memref<32x1024xf32, #tpu.memory_space<vmem>>, vector<32x256xf32>
    %130 = arith.truncf %129 : vector<32x256xf32> to vector<32x256xbf16>
    %131 = tpu.concatenate %128, %130 in 1 : vector<32x256xbf16>, vector<32x256xbf16> -> vector<32x512xbf16>
    %c0_50 = arith.constant 0 : index
    %c113_51 = arith.constant 113 : index
    %132 = vector.load %arg7[%c0_50, %c113_51] : memref<32x1024xf32, #tpu.memory_space<vmem>>, vector<32x256xf32>
    %133 = vector.broadcast %24 : vector<1x256xf32> to vector<32x256xf32>
    %134 = arith.mulf %132, %133 : vector<32x256xf32>
    %135 = arith.truncf %134 : vector<32x256xf32> to vector<32x256xbf16>
    %c0_52 = arith.constant 0 : index
    %c625_53 = arith.constant 625 : index
    %136 = vector.load %arg7[%c0_52, %c625_53] : memref<32x1024xf32, #tpu.memory_space<vmem>>, vector<32x256xf32>
    %137 = vector.broadcast %24 : vector<1x256xf32> to vector<32x256xf32>
    %138 = arith.mulf %136, %137 : vector<32x256xf32>
    %139 = arith.truncf %138 : vector<32x256xf32> to vector<32x256xbf16>
    %140 = tpu.concatenate %135, %139 in 1 : vector<32x256xbf16>, vector<32x256xbf16> -> vector<32x512xbf16>
    %c0_54 = arith.constant 0 : index
    %c127_55 = arith.constant 127 : index
    %141 = vector.load %arg7[%c0_54, %c127_55] : memref<32x1024xf32, #tpu.memory_space<vmem>>, vector<32x256xf32>
    %142 = vector.broadcast %20 : vector<1x256xf32> to vector<32x256xf32>
    %143 = arith.mulf %141, %142 : vector<32x256xf32>
    %144 = arith.truncf %143 : vector<32x256xf32> to vector<32x256xbf16>
    %c0_56 = arith.constant 0 : index
    %c639_57 = arith.constant 639 : index
    %145 = vector.load %arg7[%c0_56, %c639_57] : memref<32x1024xf32, #tpu.memory_space<vmem>>, vector<32x256xf32>
    %146 = vector.broadcast %20 : vector<1x256xf32> to vector<32x256xf32>
    %147 = arith.mulf %145, %146 : vector<32x256xf32>
    %148 = arith.truncf %147 : vector<32x256xf32> to vector<32x256xbf16>
    %149 = tpu.concatenate %144, %148 in 1 : vector<32x256xbf16>, vector<32x256xbf16> -> vector<32x512xbf16>
    %c0_58 = arith.constant 0 : index
    %c128_59 = arith.constant 128 : index
    %150 = vector.load %arg7[%c0_58, %c128_59] : memref<32x1024xf32, #tpu.memory_space<vmem>>, vector<32x256xf32>
    %151 = arith.truncf %150 : vector<32x256xf32> to vector<32x256xbf16>
    %c0_60 = arith.constant 0 : index
    %c640_61 = arith.constant 640 : index
    %152 = vector.load %arg7[%c0_60, %c640_61] : memref<32x1024xf32, #tpu.memory_space<vmem>>, vector<32x256xf32>
    %153 = arith.truncf %152 : vector<32x256xf32> to vector<32x256xbf16>
    %154 = tpu.concatenate %151, %153 in 1 : vector<32x256xbf16>, vector<32x256xbf16> -> vector<32x512xbf16>
    %c0_62 = arith.constant 0 : index
    %c129_63 = arith.constant 129 : index
    %155 = vector.load %arg7[%c0_62, %c129_63] : memref<32x1024xf32, #tpu.memory_space<vmem>>, vector<32x256xf32>
    %156 = vector.broadcast %24 : vector<1x256xf32> to vector<32x256xf32>
    %157 = arith.mulf %155, %156 : vector<32x256xf32>
    %158 = arith.truncf %157 : vector<32x256xf32> to vector<32x256xbf16>
    %c0_64 = arith.constant 0 : index
    %c641_65 = arith.constant 641 : index
    %159 = vector.load %arg7[%c0_64, %c641_65] : memref<32x1024xf32, #tpu.memory_space<vmem>>, vector<32x256xf32>
    %160 = vector.broadcast %24 : vector<1x256xf32> to vector<32x256xf32>
    %161 = arith.mulf %159, %160 : vector<32x256xf32>
    %162 = arith.truncf %161 : vector<32x256xf32> to vector<32x256xbf16>
    %163 = tpu.concatenate %158, %162 in 1 : vector<32x256xbf16>, vector<32x256xbf16> -> vector<32x512xbf16>
    %c0_66 = arith.constant 0 : index
    %c143_67 = arith.constant 143 : index
    %164 = vector.load %arg7[%c0_66, %c143_67] : memref<32x1024xf32, #tpu.memory_space<vmem>>, vector<32x256xf32>
    %165 = vector.broadcast %20 : vector<1x256xf32> to vector<32x256xf32>
    %166 = arith.mulf %164, %165 : vector<32x256xf32>
    %167 = arith.truncf %166 : vector<32x256xf32> to vector<32x256xbf16>
    %c0_68 = arith.constant 0 : index
    %c655_69 = arith.constant 655 : index
    %168 = vector.load %arg7[%c0_68, %c655_69] : memref<32x1024xf32, #tpu.memory_space<vmem>>, vector<32x256xf32>
    %169 = vector.broadcast %20 : vector<1x256xf32> to vector<32x256xf32>
    %170 = arith.mulf %168, %169 : vector<32x256xf32>
    %171 = arith.truncf %170 : vector<32x256xf32> to vector<32x256xbf16>
    %172 = tpu.concatenate %167, %171 in 1 : vector<32x256xbf16>, vector<32x256xbf16> -> vector<32x512xbf16>
    %c0_70 = arith.constant 0 : index
    %c144_71 = arith.constant 144 : index
    %173 = vector.load %arg7[%c0_70, %c144_71] : memref<32x1024xf32, #tpu.memory_space<vmem>>, vector<32x256xf32>
    %174 = arith.truncf %173 : vector<32x256xf32> to vector<32x256xbf16>
    %c0_72 = arith.constant 0 : index
    %c656_73 = arith.constant 656 : index
    %175 = vector.load %arg7[%c0_72, %c656_73] : memref<32x1024xf32, #tpu.memory_space<vmem>>, vector<32x256xf32>
    %176 = arith.truncf %175 : vector<32x256xf32> to vector<32x256xbf16>
    %177 = tpu.concatenate %174, %176 in 1 : vector<32x256xbf16>, vector<32x256xbf16> -> vector<32x512xbf16>
    %c0_74 = arith.constant 0 : index
    %c145_75 = arith.constant 145 : index
    %178 = vector.load %arg7[%c0_74, %c145_75] : memref<32x1024xf32, #tpu.memory_space<vmem>>, vector<32x256xf32>
    %179 = vector.broadcast %24 : vector<1x256xf32> to vector<32x256xf32>
    %180 = arith.mulf %178, %179 : vector<32x256xf32>
    %181 = arith.truncf %180 : vector<32x256xf32> to vector<32x256xbf16>
    %c0_76 = arith.constant 0 : index
    %c657_77 = arith.constant 657 : index
    %182 = vector.load %arg7[%c0_76, %c657_77] : memref<32x1024xf32, #tpu.memory_space<vmem>>, vector<32x256xf32>
    %183 = vector.broadcast %24 : vector<1x256xf32> to vector<32x256xf32>
    %184 = arith.mulf %182, %183 : vector<32x256xf32>
    %185 = arith.truncf %184 : vector<32x256xf32> to vector<32x256xbf16>
    %186 = tpu.concatenate %181, %185 in 1 : vector<32x256xbf16>, vector<32x256xbf16> -> vector<32x512xbf16>
    %187 = tpu.concatenate %126, %131, %140, %149, %154, %163, %172, %177, %186 in 0 : vector<32x512xbf16>, vector<32x512xbf16>, vector<32x512xbf16>, vector<32x512xbf16>, vector<32x512xbf16>, vector<32x512xbf16>, vector<32x512xbf16>, vector<32x512xbf16>, vector<32x512xbf16> -> vector<288x512xbf16>
    %c0_78 = arith.constant 0 : index
    %c0_79 = arith.constant 0 : index
    %188 = vector.load %arg4[%c0_78, %c0_79] : memref<32x288xbf16, #tpu.memory_space<vmem>>, vector<32x288xbf16>
    %cst_80 = arith.constant dense<0.000000e+00> : vector<32x512xf32>
    %189 = tpu.matmul %188, %187, %cst_80 {dimension_numbers = #tpu.dot_dimension_numbers<[1], [0], [0], [1], [0, 0, 1, 1], [], []>} : vector<32x288xbf16>, vector<288x512xbf16>, vector<32x512xf32> -> vector<32x512xf32>
    %c0_81 = arith.constant 0 : index
    %c0_82 = arith.constant 0 : index
    %190 = vector.load %arg5[%c0_81, %c0_82] : memref<32x1xf32, #tpu.memory_space<vmem>>, vector<32x1xf32>
    %191 = vector.broadcast %190 : vector<32x1xf32> to vector<32x512xf32>
    %192 = arith.addf %189, %191 : vector<32x512xf32>
    %193 = vector.extract_strided_slice %192 {offsets = [0, 0], sizes = [32, 256], strides = [1, 1]} : vector<32x512xf32> to vector<32x256xf32>
    %cst_83 = arith.constant 2.000000e-01 : f32
    %194 = vector.broadcast %cst_83 : f32 to vector<32x256xf32>
    %195 = arith.mulf %194, %193 : vector<32x256xf32>
    %196 = arith.addf %29, %195 : vector<32x256xf32>
    %c0_84 = arith.constant 0 : index
    %c0_85 = arith.constant 0 : index
    %c0_86 = arith.constant 0 : index
    %197 = vector.load %arg6[%c0_84, %c0_85, %c0_86] : memref<2x32x256xf32, #tpu.memory_space<vmem>>, vector<1x32x256xf32>
    %198 = vector.shape_cast %197 : vector<1x32x256xf32> to vector<32x256xf32>
    %199 = vector.shape_cast %196 : vector<32x256xf32> to vector<1x32x256xf32>
    tpu.vector_store %arg6[%c0_84, %c0_85, %c0_86], %199 {strides = array<i32>} : memref<2x32x256xf32, #tpu.memory_space<vmem>>, vector<1x32x256xf32>,
    %200 = vector.extract_strided_slice %192 {offsets = [0, 256], sizes = [32, 256], strides = [1, 1]} : vector<32x512xf32> to vector<32x256xf32>
    %cst_87 = arith.constant 2.000000e-01 : f32
    %201 = vector.broadcast %cst_87 : f32 to vector<32x256xf32>
    %202 = arith.mulf %201, %200 : vector<32x256xf32>
    %203 = arith.addf %31, %202 : vector<32x256xf32>
    %c1_88 = arith.constant 1 : index
    %c0_89 = arith.constant 0 : index
    %c0_90 = arith.constant 0 : index
    %204 = vector.load %arg6[%c1_88, %c0_89, %c0_90] : memref<2x32x256xf32, #tpu.memory_space<vmem>>, vector<1x32x256xf32>
    %205 = vector.shape_cast %204 : vector<1x32x256xf32> to vector<32x256xf32>
    %206 = vector.shape_cast %203 : vector<32x256xf32> to vector<1x32x256xf32>
    tpu.vector_store %arg6[%c1_88, %c0_89, %c0_90], %206 {strides = array<i32>} : memref<2x32x256xf32, #tpu.memory_space<vmem>>, vector<1x32x256xf32>,
    return
  }
  func.func @transform_0(%arg0: i32) -> (i32, i32, i32) {
    %c0_i32 = arith.constant 0 : i32
    %c0_i32_0 = arith.constant 0 : i32
    %c0_i32_1 = arith.constant 0 : i32
    return %arg0, %c0_i32, %c0_i32_0 : i32, i32, i32
  }
  func.func @transform_1(%arg0: i32) -> (i32, i32) {
    %c0_i32 = arith.constant 0 : i32
    %c0_i32_0 = arith.constant 0 : i32
    %c0_i32_1 = arith.constant 0 : i32
    return %c0_i32, %c0_i32_0 : i32, i32
  }
  func.func @transform_2(%arg0: i32) -> (i32, i32) {
    %c0_i32 = arith.constant 0 : i32
    %c0_i32_0 = arith.constant 0 : i32
    %c0_i32_1 = arith.constant 0 : i32
    return %c0_i32, %c0_i32_0 : i32, i32
  }
  func.func @transform_3(%arg0: i32) -> (i32, i32) {
    %c0_i32 = arith.constant 0 : i32
    %c0_i32_0 = arith.constant 0 : i32
    %c0_i32_1 = arith.constant 0 : i32
    return %c0_i32, %c0_i32_0 : i32, i32
  }
  func.func @transform_4(%arg0: i32) -> (i32, i32) {
    %c0_i32 = arith.constant 0 : i32
    %c0_i32_0 = arith.constant 0 : i32
    %c0_i32_1 = arith.constant 0 : i32
    return %c0_i32, %c0_i32_0 : i32, i32
  }
  func.func @transform_5(%arg0: i32) -> (i32, i32, i32) {
    %c0_i32 = arith.constant 0 : i32
    %c0_i32_0 = arith.constant 0 : i32
    %c0_i32_1 = arith.constant 0 : i32
    return %arg0, %c0_i32, %c0_i32_0 : i32, i32, i32
  }
}

</mosaic_0001>

<bundles_post_ra>
// kernel: resblock_forward.1
= control target key start
LH: loop header
LB: loop body
LE: loop exit
PB: predicated region body
PF: predicated region fallthrough
CT: control target
= control target key end

     0   :  { %v21_v0 = vlaneseq  ;;  %s2428_s22 = smov 16   ;;  %v2429_v8 = vmov 0.0   ;;  %s2430_s23 = smov 111   ;;  %v4440_v23 = vmov 0.0|0.0   ;;  %vm324_vm4 = vcmask 924672   ;;  %s4414_s0 = inlined_call_operand.vmem [shape: f32[2,32,256], index: 0, kind: input, shape index: {}]   ;;  %s4415_s1 = inlined_call_operand.vmem [shape: bf16[32,288], index: 1, kind: input, shape index: {}]   ;;  %s4416_s2 = inlined_call_operand.vmem [shape: f32[32,1], index: 2, kind: input, shape index: {}]   ;;  %s4417_s3 = inlined_call_operand.vmem [shape: bf16[32,288], index: 3, kind: input, shape index: {}]   ;;  %s4418_s4 = inlined_call_operand.vmem [shape: f32[32,1], index: 4, kind: input, shape index: {}]   ;;  %s4419_s5 = inlined_call_operand.vmem [shape: f32[2,32,256], index: 5, kind: output, shape index: {}]  }
   0x1   :  { %v2472_v1 = vld [vmem:[%s4414_s0] sm:$0xff]  ;;  %v2477_v2 = vld [vmem:[%s4414_s0 + $0x10] sm:$0xff]  ;;  %s2431_s24 = smov 127   ;;  %s2432_s29 = smov 113   ;;  %v2506_v18 = vld [vmem:[%s4414_s0 + $0x8] sm:$0xff]  ;;  %vm422_vm5 = vcmask 1039360  }
   0x2   :  { %v2481_v3 = vpack.c.bf16 %v2477_v2, %v2472_v1  ;;  %v22_v4 = vand.u32 127, %v21_v0  ;;  %v2490_v15 = vld [vmem:[%s4414_s0 + $0x40] sm:$0xff]  ;;  %v2495_v16 = vld [vmem:[%s4414_s0 + $0x50] sm:$0xff]  ;;  %s2433_s30 = smov 1   ;;  %v2511_v19 = vld [vmem:[%s4414_s0 + $0x18] sm:$0xff]  ;;  %s2434_s10 = smov 15  }
   0x3   :  { %v2501_v17 = vpack.c.bf16 %v2495_v16, %v2490_v15  ;;  %v2518_v20 = vpack.c.bf16 %v2511_v19, %v2506_v18  ;;  %v2523_v21 = vld [vmem:[%s4414_s0 + $0x48] sm:$0xff]  ;;  %v2528_v22 = vld [vmem:[%s4414_s0 + $0x58] sm:$0xff]  ;;  %v2553_v27 = vld [vmem:[%s4414_s0 + $0x20] sm:$0xff]  ;;  %s2436_s21 = smov 17   ;;  %vm147_vm6 = vcmask 908288   ;;  %vm481_vm7 = vcmask 7168  }
   0x4   :  { %273 = vrot.lane.b32.xlu1 %v2481_v3, %s2428_s22  ;;  %v23_v5 = vadd.s32 128, %v22_v4  ;;  %v28_v6 = vand.u32 15, %v22_v4  ;;  %v2536_v24 = vpack.c.bf16 %v2528_v22, %v2523_v21  ;;  %v2541_v25 = vld [vmem:[%s4414_s0 + $0x28] sm:$0xff]  ;;  %v2546_v26 = vld [vmem:[%s4414_s0 + $0x38] sm:$0xff]  ;;  %v2563_v29 = vld [vmem:[%s4414_s0 + $0x30] sm:$0xff]  ;;  %vm383_vm8 = vcmask 121856  }
   0x5   :  { %v2558_v28 = vpack.c.bf16 %v2546_v26, %v2541_v25  ;;  %v2568_v30 = vld [vmem:[%s4414_s0 + $0x68] sm:$0xff]  ;;  %v2573_v31 = vld [vmem:[%s4414_s0 + $0x78] sm:$0xff]  ;;  %v2579_v32 = vpack.c.bf16 %v2563_v29, %v2553_v27  ;;  %v2590_v34 = vld [vmem:[%s4414_s0 + $0x60] sm:$0xff]  ;;  %s2438_s13 = smov 112   ;;  %vm218_vm9 = vcmask 138240   ;;  %vm283_vm10 = vcmask 130048  }
   0x6   :  { %v35_v7 = vand.u32 15, %v23_v5  ;;  %vm48_vm0 = vcmp.gt.s32.totalorder %v28_v6, 0  ;;  %vm54_vm1 = vcmp.lt.s32.totalorder %v28_v6, 15  ;;  %v2585_v33 = vpack.c.bf16 %v2573_v31, %v2568_v30  ;;  %v2595_v35 = vld [vmem:[%s4414_s0 + $0x70] sm:$0xff] }
   0x7   :  { %v2249_v9 = vsel %vm48_vm0, 1.0, %v2429_v8  ;;  %v2251_v11 = vsel %vm54_vm1, 1.0, %v2429_v8  ;;  %v2601_v36 = vpack.c.bf16 %v2595_v35, %v2590_v34  ;;  %vm750_vm11 = vcmask 916480  }
   0x8   :  { %vm49_vm2 = vcmp.gt.s32.totalorder %v35_v7, 0  ;;  %vm55_vm3 = vcmp.lt.s32.totalorder %v35_v7, 15  ;;  %vm945_vm12 = vcmask 261120  }
   0x9   :  { %v2250_v10 = vsel %vm49_vm2, 1.0, %v2429_v8  ;;  %v2252_v12 = vsel %vm55_vm3, 1.0, %v2429_v8  ;;  %4477 = vst [vmem:[#allocation3_spill] sm:$0xff] %v2601_v36 }
   0xa   :  { %v2364_v13 = vpack.i.bf16 %v2250_v10, %v2249_v9  ;;  %v2369_v14 = vpack.i.bf16 %v2252_v12, %v2251_v11 }
   0xc   :  { %2365 = vrot.lane.b32.xlu0 %v2364_v13, %s2430_s23  ;;  %2375 = vrot.lane.b32.xlu1 %v2364_v13, %s2431_s24 }
  0x10   :  { %2370 = vrot.lane.b32.xlu0 %v2369_v14, %s2432_s29  ;;  %2380 = vrot.lane.b32.xlu1 %v2369_v14, %s2433_s30 }
  0x14   :  { %2385 = vrot.lane.b32.xlu0 %v2364_v13, %s2434_s10  ;;  %300 = vrot.lane.b32.xlu1 %v2501_v17, %s2428_s22 }
  0x18   :  { %275 = vrot.lane.b32.xlu0 %v2518_v20, %s2428_s22  ;;  %271 = vrot.lane.b32.xlu1 %v4440_v23, %s2428_s22 }
  0x1c   :  { %302 = vrot.lane.b32.xlu0 %v2536_v24, %s2428_s22  ;;  %2390 = vrot.lane.b32.xlu1 %v2369_v14, %s2436_s21 }
  0x20   :  { %298 = vrot.lane.b32.xlu0 %v4440_v23, %s2428_s22  ;;  %281 = vrot.lane.b32.xlu1 %v2558_v28, %s2428_s22 }
  0x24   :  { %279 = vrot.lane.b32.xlu0 %v2579_v32, %s2428_s22  ;;  %308 = vrot.lane.b32.xlu1 %v2585_v33, %s2428_s22 }
  0x28   :  { %306 = vrot.lane.b32.xlu0 %v2601_v36, %s2428_s22  ;;  %304 = vrot.lane.b32.xlu1 %v4440_v23, %s2428_s22 }
  0x2c   :  { %277 = vrot.lane.b32.xlu0 %v4440_v23, %s2428_s22 }
  0x76   :  { %v2616_v40 = vpop.permute.xlu1 %273 }
  0x7e   :  { %v2611_v37 = vpop.permute.xlu0 %2365  ;;  %v2629_v45 = vpop.permute.xlu1 %2375 }
  0x7f   :  { %v2367_v38 = vunpack.i.l.bf16 %v2611_v37  ;;  %v2377_v46 = vunpack.i.l.bf16 %v2629_v45  ;;  %v2675_v59 = vunpack.i.h.bf16 %v2611_v37 }
  0x81   :  { %v152_v39 = vmul.f32 0.0, %v2367_v38  ;;  %v427_v48 = vmul.f32 0.0, %v2377_v46  ;;  %4480 = vst [vmem:[#allocation6_spill] sm:$0xff] %v2675_v59  ;;  %v154_v0 = vmul.f32 %v2675_v59, %v2506_v18  ;;  %v157_v4 = vmul.f32 %v2675_v59, %v2511_v19 }
  0x82   :  { %v2618_v41 = vpop.permute.xlu0 %2370  ;;  %v2644_v49 = vpop.permute.xlu1 %2380  ;;  %v184_v9 = vmul.f32 %v2675_v59, %v2523_v21  ;;  %v187_v10 = vmul.f32 %v2675_v59, %v2528_v22 }
  0x83   :  { %v2620_v42 = vpack.c.bf16 %v152_v39, %v152_v39  ;;  %v2372_v43 = vunpack.i.l.bf16 %v2618_v41  ;;  %v2647_v50 = vunpack.i.l.bf16 %v2644_v49  ;;  %v2649_v51 = vpack.c.bf16 %v427_v48, %v427_v48 }
  0x84   :  { %v2668_v56 = vunpack.i.h.bf16 %v2618_v41  ;;  %v166_v12 = vpack.c.bf16 %v157_v4, %v154_v0  ;;  %v2708_v39 = vunpack.i.h.bf16 %v2629_v45 }
  0x85   :  { %v329_v44 = vmul.f32 0.0, %v2372_v43  ;;  %233 = vrot.lane.b32.xlu0 %v2620_v42, %s2436_s21  ;;  %206 = vrot.lane.b32.xlu1 %v2620_v42, %s2436_s21  ;;  %4478 = vst [vmem:[#allocation4_spill] sm:$0xff] %v2647_v50  ;;  %v559_v52 = vmul.f32 %v2647_v50, %v2490_v15  ;;  %v562_v53 = vmul.f32 %v2647_v50, %v2495_v16 }
  0x86   :  { %v529_v54 = vmul.f32 %v2647_v50, %v2472_v1  ;;  %v532_v55 = vmul.f32 %v2647_v50, %v2477_v2  ;;  %4479 = vst [vmem:[#allocation5_spill] sm:$0xff] %v2668_v56  ;;  %v331_v60 = vmul.f32 %v2668_v56, %v2506_v18  ;;  %v334_v61 = vmul.f32 %v2668_v56, %v2511_v19 }
  0x87   :  { %v2632_v47 = vpack.c.bf16 %v329_v44, %v329_v44  ;;  %v571_v57 = vpack.c.bf16 %v562_v53, %v559_v52  ;;  %v535_v62 = vmul.f32 %v2647_v50, %v2553_v27  ;;  %v538_v63 = vmul.f32 %v2647_v50, %v2563_v29  ;;  %4481 = vst [vmem:[#allocation7_spill] sm:$0xff] %v2708_v39 }
  0x88   :  { %v541_v58 = vpack.c.bf16 %v532_v55, %v529_v54  ;;  %v343_v5 = vpack.c.bf16 %v334_v61, %v331_v60  ;;  %v349_v7 = vmul.f32 %v2668_v56, %v2523_v21  ;;  %v352_v8 = vmul.f32 %v2668_v56, %v2528_v22 }
  0x89   :  { %239 = vrot.lane.b32.xlu0 %v2620_v42, %s2436_s21  ;;  %212 = vrot.lane.b32.xlu1 %v2620_v42, %s2436_s21  ;;  %v544_v6 = vpack.c.bf16 %v538_v63, %v535_v62  ;;  %v337_v13 = vmul.f32 %v2668_v56, %v2541_v25  ;;  %v340_v14 = vmul.f32 %v2668_v56, %v2546_v26 }
  0x8a   :  { %v361_v11 = vpack.c.bf16 %v352_v8, %v349_v7  ;;  %v196_v44 = vpack.c.bf16 %v187_v10, %v184_v9  ;;  %v355_v48 = vmul.f32 %v2668_v56, %v2568_v30  ;;  %v358_v53 = vmul.f32 %v2668_v56, %v2573_v31 }
  0x8b   :  { %v346_v52 = vpack.c.bf16 %v340_v14, %v337_v13  ;;  %v160_v54 = vmul.f32 %v2675_v59, %v2541_v25  ;;  %v163_v55 = vmul.f32 %v2675_v59, %v2546_v26  ;;  %v190_v62 = vmul.f32 %v2675_v59, %v2568_v30 }
  0x8c   :  { %v364_v60 = vpack.c.bf16 %v358_v53, %v355_v48  ;;  %v193_v63 = vmul.f32 %v2675_v59, %v2573_v31  ;;  %v2732_v0 = vsel %vm324_vm4, %v2372_v43, %v2668_v56  ;;  %v450_v41 = vmul.f32 %v2708_v39, %v2528_v22 }
  0x8d   :  { %371 = vrot.lane.b32.xlu0 %v2632_v47, %s2434_s10  ;;  %398 = vrot.lane.b32.xlu1 %v2632_v47, %s2434_s10  ;;  %v169_v61 = vpack.c.bf16 %v163_v55, %v160_v54  ;;  %4482 = vst [vmem:[#allocation8_spill] sm:$0xff] %v2732_v0  ;;  %v330_v43 = vmul.f32 %v2732_v0, %v2472_v1 }
  0x8e   :  { %v199_v7 = vpack.c.bf16 %v193_v63, %v190_v62  ;;  %v333_v8 = vmul.f32 %v2732_v0, %v2477_v2  ;;  %v435_v9 = vmul.f32 %v2708_v39, %v2541_v25  ;;  %v438_v10 = vmul.f32 %v2708_v39, %v2546_v26 }
  0x8f   :  { %v348_v13 = vmul.f32 %v2490_v15, %v2732_v0  ;;  %v351_v14 = vmul.f32 %v2495_v16, %v2732_v0  ;;  %v456_v54 = vmul.f32 %v2708_v39, %v2573_v31  ;;  %v336_v55 = vmul.f32 %v2732_v0, %v2553_v27 }
  0x90   :  { %v444_v48 = vpack.c.bf16 %v438_v10, %v435_v9  ;;  %v357_v62 = vmul.f32 %v2595_v35, %v2732_v0  ;;  %v2777_v63 = vsel %vm422_vm5, %v2377_v46, %v2708_v39 }
  0x91   :  { %377 = vrot.lane.b32.xlu0 %v2632_v47, %s2434_s10  ;;  %404 = vrot.lane.b32.xlu1 %v2632_v47, %s2434_s10  ;;  %v360_v53 = vpack.c.bf16 %v351_v14, %v348_v13  ;;  %4483 = vst [vmem:[#allocation9_spill] sm:$0xff] %v2777_v63  ;;  %v446_v46 = vmul.f32 %v2490_v15, %v2777_v63 }
  0x92   :  { %v434_v9 = vmul.f32 %v2777_v63, %v2553_v27  ;;  %v437_v10 = vmul.f32 %v2777_v63, %v2563_v29  ;;  %v452_v13 = vmul.f32 %v2590_v34, %v2777_v63 }
  0x94   :  { %v443_v14 = vpack.c.bf16 %v437_v10, %v434_v9 }
  0x95   :  { %496 = vrot.lane.b32.xlu1 %v2649_v51, %s2433_s30  ;;  %469 = vrot.lane.b32.xlu0 %v2649_v51, %s2433_s30 }
  0x99   :  { %502 = vrot.lane.b32.xlu1 %v2649_v51, %s2433_s30  ;;  %475 = vrot.lane.b32.xlu0 %v2649_v51, %s2433_s30 }
  0x9d   :  { %610 = vrot.lane.b32.xlu1 %v571_v57, %s2431_s24  ;;  %583 = vrot.lane.b32.xlu0 %v541_v58, %s2431_s24  ;;  %v429_v57 = vmul.f32 %v2708_v39, %v2506_v18  ;;  %v432_v58 = vmul.f32 %v2708_v39, %v2511_v19 }
  0x9f   :  { %v441_v4 = vpack.c.bf16 %v432_v58, %v429_v57  ;;  %v339_v57 = vmul.f32 %v2732_v0, %v2563_v29 }
  0xa1   :  { %375 = vrot.lane.b32.xlu1 %v343_v5, %s2434_s10  ;;  %589 = vrot.lane.b32.xlu0 %v544_v6, %s2431_s24  ;;  %v447_v5 = vmul.f32 %v2708_v39, %v2523_v21  ;;  %v4420_v6 = vmov 0  }
  0xa2   :  { %2395 = vset.pattern.permute.xlu1 %v4420_v6  ;;  %2394 = vset.pattern.permute.xlu0 %v4420_v6 }
  0xa5   :  { %402 = vrot.lane.b32.xlu1 %v361_v11, %s2434_s10  ;;  %210 = vrot.lane.b32.xlu0 %v166_v12, %s2436_s21  ;;  %v459_v11 = vpack.c.bf16 %v450_v41, %v447_v5  ;;  %v342_v12 = vpack.c.bf16 %v333_v8, %v330_v43  ;;  %v431_v41 = vmul.f32 %v2777_v63, %v2477_v2 }
  0xa6   :  { %v449_v43 = vmul.f32 %v2495_v16, %v2777_v63 }
  0xa8   :  { %v458_v8 = vpack.c.bf16 %v449_v43, %v446_v46  ;;  %v2847_v46 = vpop.permute.xlu1 %300 }
  0xa9   :  { %381 = vrot.lane.b32.xlu1 %v346_v52, %s2434_s10  ;;  %237 = vrot.lane.b32.xlu0 %v196_v44, %s2436_s21  ;;  %v2383_v44 = vunpack.i.h.bf16 %v2644_v49  ;;  %v453_v52 = vmul.f32 %v2708_v39, %v2568_v30 }
  0xab   :  { %v531_v49 = vmul.f32 0.0, %v2383_v44  ;;  %v462_v58 = vpack.c.bf16 %v456_v54, %v453_v52 }
  0xad   :  { %408 = vrot.lane.b32.xlu1 %v364_v60, %s2434_s10  ;;  %216 = vrot.lane.b32.xlu0 %v169_v61, %s2436_s21  ;;  %v345_v60 = vpack.c.bf16 %v339_v57, %v336_v55  ;;  %v354_v61 = vmul.f32 %v2590_v34, %v2732_v0 }
  0xaf   :  { %v363_v5 = vpack.c.bf16 %v357_v62, %v354_v61 }
  0xb1   :  { %473 = vrot.lane.b32.xlu1 %v441_v4, %s2433_s30  ;;  %243 = vrot.lane.b32.xlu0 %v199_v7, %s2436_s21  ;;  %v2781_v4 = vpack.c.bf16 %v531_v49, %v531_v49  ;;  %v428_v7 = vmul.f32 %v2777_v63, %v2472_v1  ;;  %v2386_v49 = vpop.permute.xlu0 %2385 }
  0xb3   :  { %v440_v45 = vpack.c.bf16 %v431_v41, %v428_v7 }
  0xb5   :  { %500 = vrot.lane.b32.xlu1 %v459_v11, %s2433_s30  ;;  %373 = vrot.lane.b32.xlu0 %v342_v12, %s2434_s10  ;;  %v2805_v11 = vsel %vm147_vm6, %v2367_v38, %v2675_v59  ;;  %v2812_v12 = vsel %vm481_vm7, %v2647_v50, %v2383_v44  ;;  %v2849_v43 = vpop.permute.xlu0 %275 }
  0xb6   :  { %4484 = vst [vmem:[#allocation10_spill] sm:$0xff] %v2805_v11  ;;  %4485 = vst [vmem:[#allocation11_spill] sm:$0xff] %v2812_v12  ;;  %v153_v37 = vmul.f32 %v2805_v11, %v2472_v1  ;;  %v156_v38 = vmul.f32 %v2805_v11, %v2477_v2  ;;  %v530_v44 = vmul.f32 %v2812_v12, %v2506_v18 }
  0xb7   :  { %v533_v52 = vmul.f32 %v2812_v12, %v2511_v19  ;;  %v183_v55 = vmul.f32 %v2490_v15, %v2805_v11  ;;  %v186_v57 = vmul.f32 %v2495_v16, %v2805_v11  ;;  %v162_v7 = vmul.f32 %v2805_v11, %v2563_v29 }
  0xb8   :  { %v165_v54 = vpack.c.bf16 %v156_v38, %v153_v37  ;;  %v539_v9 = vmul.f32 %v2812_v12, %v2546_v26  ;;  %v189_v10 = vmul.f32 %v2590_v34, %v2805_v11  ;;  %v566_v37 = vmul.f32 %v2568_v30, %v2812_v12 }
  0xb9   :  { %479 = vrot.lane.b32.xlu1 %v444_v48, %s2433_s30  ;;  %400 = vrot.lane.b32.xlu0 %v360_v53, %s2434_s10  ;;  %v455_v48 = vmul.f32 %v2595_v35, %v2777_v63  ;;  %v542_v61 = vpack.c.bf16 %v533_v52, %v530_v44  ;;  %v195_v62 = vpack.c.bf16 %v186_v57, %v183_v55  ;;  %v2865_v44 = vpop.permute.xlu0 %302 }
  0xba   :  { %v569_v38 = vmul.f32 %v2573_v31, %v2812_v12  ;;  %v568_v55 = vmul.f32 %v2647_v50, %v2595_v35 }
  0xbb   :  { %v461_v53 = vpack.c.bf16 %v455_v48, %v452_v13  ;;  %v192_v13 = vmul.f32 %v2595_v35, %v2805_v11  ;;  %v2857_v48 = vunpack.i.l.bf16 %v2386_v49 }
  0xbd   :  { %506 = vrot.lane.b32.xlu1 %v462_v58, %s2433_s30  ;;  %379 = vrot.lane.b32.xlu0 %v345_v60, %s2434_s10  ;;  %v560_v58 = vmul.f32 %v2523_v21, %v2812_v12  ;;  %v563_v60 = vmul.f32 %v2528_v22, %v2812_v12  ;;  %4486 = vst [vmem:[#allocation12_spill] sm:$0xff] %v2857_v48 }
  0xbf   :  { %v572_v41 = vpack.c.bf16 %v563_v60, %v560_v58  ;;  %v575_v60 = vpack.c.bf16 %v569_v38, %v566_v37 }
  0xc1   :  { %587 = vrot.lane.b32.xlu1 %v2781_v4, %s2431_s24  ;;  %406 = vrot.lane.b32.xlu0 %v363_v5, %s2434_s10  ;;  %v159_v5 = vmul.f32 %v2805_v11, %v2553_v27 }
  0xc5   :  { %614 = vrot.lane.b32.xlu1 %v2781_v4, %s2431_s24  ;;  %471 = vrot.lane.b32.xlu0 %v440_v45, %s2433_s30  ;;  %v536_v45 = vmul.f32 %v2812_v12, %v2541_v25 }
  0xc7   :  { %v545_v52 = vpack.c.bf16 %v539_v9, %v536_v45 }
  0xc9   :  { %593 = vrot.lane.b32.xlu1 %v2781_v4, %s2431_s24  ;;  %498 = vrot.lane.b32.xlu0 %v458_v8, %s2433_s30  ;;  %v168_v8 = vpack.c.bf16 %v162_v7, %v159_v5  ;;  %v2883_v7 = vpop.permute.xlu0 %298 }
  0xcd   :  { %620 = vrot.lane.b32.xlu1 %v2781_v4, %s2431_s24  ;;  %477 = vrot.lane.b32.xlu0 %v443_v14, %s2433_s30  ;;  %v2388_v14 = vunpack.i.h.bf16 %v2386_v49  ;;  %v2875_v49 = vpop.permute.xlu1 %271 }
  0xcf   :  { %v2873_v57 = vsel %vm383_vm8, %v2857_v48, %v2388_v14  ;;  %v641_v58 = vmul.f32 0.0, %v2388_v14  ;;  %v2900_v14 = vpop.permute.xlu0 %279 }
  0xd0   :  { %4487 = vst [vmem:[#allocation13_spill] sm:$0xff] %v2873_v57  ;;  %v643_v5 = vmul.f32 %v2873_v57, %v2511_v19  ;;  %v658_v9 = vmul.f32 %v2523_v21, %v2873_v57 }
  0xd1   :  { %504 = vrot.lane.b32.xlu0 %v461_v53, %s2433_s30  ;;  %208 = vrot.lane.b32.xlu1 %v165_v54, %s2436_s21  ;;  %v198_v53 = vpack.c.bf16 %v192_v13, %v189_v10  ;;  %v565_v54 = vmul.f32 %v2647_v50, %v2590_v34  ;;  %v2889_v45 = vpack.c.bf16 %v641_v58, %v641_v58  ;;  %v2398_v50 = vld [vmem:[%s4415_s1 + $0x4] ss:$12 sps:$4 sm:$0xff]  }
  0xd2   :  { %v661_v10 = vmul.f32 %v2528_v22, %v2873_v57  ;;  %v639_v13 = vmul.f32 %v2857_v48, %v2472_v1  ;;  %984 = vmatprep.mubr.bf16.mxu0 %v2398_v50  ;;  %1090 = vmatprep.mubr.bf16.mxu1 %v2398_v50 }
  0xd3   :  { %4488 = vst [vmem:[#allocation14_spill] sm:$0xff] %v2889_v45 }
  0xd4   :  { %v670_v38 = vpack.c.bf16 %v661_v10, %v658_v9  ;;  %v664_v9 = vmul.f32 %v2568_v30, %v2873_v57  ;;  %v667_v10 = vmul.f32 %v2573_v31, %v2873_v57 }
  0xd5   :  { %585 = vrot.lane.b32.xlu0 %v542_v61, %s2431_s24  ;;  %235 = vrot.lane.b32.xlu1 %v195_v62, %s2436_s21  ;;  %v574_v61 = vpack.c.bf16 %v568_v55, %v565_v54  ;;  %v640_v62 = vmul.f32 %v2873_v57, %v2506_v18  ;;  %v660_v54 = vmul.f32 %v2857_v48, %v2495_v16 }
  0xd9   :  { %612 = vrot.lane.b32.xlu0 %v572_v41, %s2431_s24  ;;  %214 = vrot.lane.b32.xlu1 %v168_v8, %s2436_s21  ;;  %v2887_v41 = vpop.permute.xlu1 %2390  ;;  %v652_v8 = vpack.c.bf16 %v643_v5, %v640_v62  ;;  %v2917_v62 = vpop.permute.xlu0 %306 }
  0xdd   :  { %591 = vrot.lane.b32.xlu0 %v545_v52, %s2431_s24  ;;  %241 = vrot.lane.b32.xlu1 %v198_v53, %s2436_s21  ;;  %v2902_v37 = vpop.permute.xlu1 %281  ;;  %v642_v52 = vmul.f32 %v2857_v48, %v2477_v2  ;;  %v657_v53 = vmul.f32 %v2857_v48, %v2490_v15 }
  0xdf   :  { %v651_v55 = vpack.c.bf16 %v642_v52, %v639_v13  ;;  %v669_v58 = vpack.c.bf16 %v660_v54, %v657_v53  ;;  %v645_v13 = vmul.f32 %v2857_v48, %v2553_v27  ;;  %v673_v53 = vpack.c.bf16 %v667_v10, %v664_v9 }
  0xe0   :  { %v648_v54 = vmul.f32 %v2857_v48, %v2563_v29 }
  0xe1   :  { %618 = vrot.lane.b32.xlu0 %v575_v60, %s2431_s24  ;;  %616 = vrot.lane.b32.xlu1 %v574_v61, %s2431_s24  ;;  %v646_v60 = vmul.f32 %v2873_v57, %v2541_v25  ;;  %v649_v61 = vmul.f32 %v2873_v57, %v2546_v26  ;;  %v2919_v5 = vpop.permute.xlu1 %308 }
  0xe5   :  { %683 = vrot.lane.b32.xlu0 %v652_v8, %s2432_s29  ;;  %685 = vrot.lane.b32.xlu1 %v2889_v45, %s2432_s29  ;;  %v655_v8 = vpack.c.bf16 %v649_v61, %v646_v60  ;;  %v2934_v52 = vpop.permute.xlu1 %304 }
  0xe9   :  { %710 = vrot.lane.b32.xlu0 %v670_v38, %s2432_s29  ;;  %712 = vrot.lane.b32.xlu1 %v2889_v45, %s2432_s29  ;;  %v2932_v38 = vpop.permute.xlu0 %277 }
  0xed   :  { %681 = vrot.lane.b32.xlu0 %v651_v55, %s2432_s29  ;;  %708 = vrot.lane.b32.xlu1 %v669_v58, %s2432_s29  ;;  %v663_v55 = vmul.f32 %v2857_v48, %v2590_v34  ;;  %v666_v58 = vmul.f32 %v2857_v48, %v2595_v35 }
  0xef   :  { %v672_v9 = vpack.c.bf16 %v666_v58, %v663_v55 }
  0xf1   :  { %689 = vrot.lane.b32.xlu0 %v655_v8, %s2432_s29  ;;  %691 = vrot.lane.b32.xlu1 %v2889_v45, %s2432_s29  ;;  %v654_v8 = vpack.c.bf16 %v648_v54, %v645_v13 }
  0xf5   :  { %716 = vrot.lane.b32.xlu0 %v673_v53, %s2432_s29  ;;  %718 = vrot.lane.b32.xlu1 %v2889_v45, %s2432_s29 }
  0xf7   :  { %v2945_v60 = vpop.permute.xlu0 %233  ;;  %v2947_v61 = vpop.permute.xlu1 %206 }
  0xf9   :  { %687 = vrot.lane.b32.xlu0 %v654_v8, %s2432_s29  ;;  %714 = vrot.lane.b32.xlu1 %v672_v9, %s2432_s29  ;;  %v2393_v8 = vunpack.i.h.bf16 %v2887_v41  ;;  %v2981_v9 = vunpack.i.l.bf16 %v2887_v41 }
  0xfb   :  { %v2951_v10 = vpop.permute.xlu0 %239  ;;  %v2953_v6 = vpop.permute.xlu1 %212  ;;  %4489 = vst [vmem:[#allocation15_spill] sm:$0xff] %v2981_v9  ;;  %v2993_v56 = vsel %vm218_vm9, %v2981_v9, %v2393_v8  ;;  %v796_v41 = vmul.f32 0.0, %v2393_v8  ;;  %v794_v50 = vmul.f32 %v2981_v9, %v2472_v1 }
  0xfc   :  { %4490 = vst [vmem:[#allocation16_spill] sm:$0xff] %v2993_v56  ;;  %v795_v0 = vmul.f32 %v2993_v56, %v2506_v18  ;;  %v798_v48 = vmul.f32 %v2993_v56, %v2511_v19  ;;  %v813_v19 = vmul.f32 %v2523_v21, %v2993_v56  ;;  %v812_v21 = vmul.f32 %v2981_v9, %v2490_v15 }
  0xfd   :  { %740 = vrot.lane.b32.xlu0 %v2518_v20, %s2438_s13  ;;  %742 = vrot.lane.b32.xlu1 %v4440_v23, %s2438_s13  ;;  %v3014_v8 = vpack.c.bf16 %v796_v41, %v796_v41  ;;  %v804_v15 = vmul.f32 %v2993_v56, %v2546_v26 }
  0xfe   :  { %v807_v11 = vpack.c.bf16 %v798_v48, %v795_v0  ;;  %v797_v0 = vmul.f32 %v2981_v9, %v2477_v2  ;;  %v801_v2 = vmul.f32 %v2993_v56, %v2541_v25  ;;  %v800_v25 = vmul.f32 %v2981_v9, %v2553_v27 }
  0xff   :  { %v2959_v53 = vpop.permute.xlu0 %371  ;;  %v2961_v57 = vpop.permute.xlu1 %398  ;;  %4493 = vst [vmem:[#allocation19_spill] sm:$0xff] %v3014_v8 }
 0x100   :  { %v806_v48 = vpack.c.bf16 %v797_v0, %v794_v50  ;;  %v822_v50 = vmul.f32 %v2573_v31, %v2993_v56  ;;  %v821_v31 = vmul.f32 %v2981_v9, %v2595_v35 }
 0x101   :  { %767 = vrot.lane.b32.xlu0 %v2536_v24, %s2438_s13  ;;  %769 = vrot.lane.b32.xlu1 %v4440_v23, %s2438_s13 }
 0x103   :  { %v2967_v13 = vpop.permute.xlu0 %377  ;;  %v2969_v54 = vpop.permute.xlu1 %404 }
 0x105   :  { %738 = vrot.lane.b32.xlu0 %v2481_v3, %s2438_s13  ;;  %765 = vrot.lane.b32.xlu1 %v2501_v17, %s2438_s13 }
 0x107   :  { %v2975_v55 = vpop.permute.xlu1 %496  ;;  %v2977_v58 = vpop.permute.xlu0 %469 }
 0x109   :  { %746 = vrot.lane.b32.xlu0 %v2558_v28, %s2438_s13  ;;  %748 = vrot.lane.b32.xlu1 %v4440_v23, %s2438_s13 }
 0x10b   :  { %v2987_v12 = vpop.permute.xlu1 %502  ;;  %v2989_v39 = vpop.permute.xlu0 %475 }
 0x10d   :  { %773 = vrot.lane.b32.xlu0 %v2585_v33, %s2438_s13  ;;  %775 = vrot.lane.b32.xlu1 %v4440_v23, %s2438_s13 }
 0x10f   :  { %v2999_v63 = vpop.permute.xlu1 %610  ;;  %v3001_v59 = vpop.permute.xlu0 %583 }
 0x110   :  { %4491 = vst [vmem:[#allocation17_spill] sm:$0xff] %v2999_v63  ;;  %4492 = vst [vmem:[#allocation18_spill] sm:$0xff] %v3001_v59  ;;  %v816_v63 = vmul.f32 %v2528_v22, %v2993_v56  ;;  %v815_v22 = vmul.f32 %v2981_v9, %v2495_v16  ;;  %v819_v59 = vmul.f32 %v2568_v30, %v2993_v56 }
 0x111   :  { %744 = vrot.lane.b32.xlu0 %v2579_v32, %s2438_s13  ;;  %771 = vrot.lane.b32.xlu1 %v2601_v36, %s2438_s13  ;;  %v818_v30 = vmul.f32 %v2981_v9, %v2590_v34  ;;  %v892_v34 = vld [vmem:[%s4416_s2 + $0x8] sm:$0xff] }
 0x113   :  { %v3016_v23 = vpop.permute.xlu1 %375  ;;  %v3018_v18 = vpop.permute.xlu0 %589 }
 0x114   :  { %4494 = vst [vmem:[#allocation20_spill] sm:$0xff] %v3018_v18  ;;  %v825_v18 = vpack.c.bf16 %v816_v63, %v813_v19  ;;  %v824_v63 = vpack.c.bf16 %v815_v22, %v812_v21  ;;  %v810_v19 = vpack.c.bf16 %v804_v15, %v801_v2  ;;  %v828_v21 = vpack.c.bf16 %v822_v50, %v819_v59  ;;  %v894_v15 = vld [vmem:[%s4416_s2 + $0x18] sm:$0xff] }
 0x115   :  { %838 = vrot.lane.b32.xlu0 %v807_v11, %s2430_s23  ;;  %840 = vrot.lane.b32.xlu1 %v3014_v8, %s2430_s23  ;;  %v803_v22 = vmul.f32 %v2981_v9, %v2563_v29  ;;  %v827_v59 = vpack.c.bf16 %v821_v31, %v818_v30  ;;  %v891_v29 = vld [vmem:[%s4416_s2] sm:$0xff] }
 0x117   :  { %v3029_v41 = vpop.permute.xlu1 %402  ;;  %v3031_v36 = vpop.permute.xlu0 %210 }
 0x119   :  { %865 = vrot.lane.b32.xlu0 %v825_v18, %s2430_s23  ;;  %867 = vrot.lane.b32.xlu1 %v3014_v8, %s2430_s23 }
 0x11b   :  { %v3042_v1 = vpop.permute.xlu1 %381  ;;  %v3044_v11 = vpop.permute.xlu0 %237 }
 0x11d   :  { %836 = vrot.lane.b32.xlu0 %v806_v48, %s2430_s23  ;;  %863 = vrot.lane.b32.xlu1 %v824_v63, %s2430_s23  ;;  %v809_v63 = vpack.c.bf16 %v803_v22, %v800_v25 }
 0x11f   :  { %v3052_v16 = vpop.permute.xlu1 %408  ;;  %v3054_v18 = vpop.permute.xlu0 %216 }
 0x121   :  { %844 = vrot.lane.b32.xlu0 %v810_v19, %s2430_s23  ;;  %846 = vrot.lane.b32.xlu1 %v3014_v8, %s2430_s23  ;;  %v893_v19 = vld [vmem:[%s4416_s2 + $0x10] sm:$0xff] }
 0x123   :  { %v3065_v26 = vpop.permute.xlu1 %473  ;;  %v3067_v0 = vpop.permute.xlu0 %243 }
 0x125   :  { %871 = vrot.lane.b32.xlu0 %v828_v21, %s2430_s23  ;;  %873 = vrot.lane.b32.xlu1 %v3014_v8, %s2430_s23 }
 0x127   :  { %v3078_v27 = vpop.permute.xlu1 %500  ;;  %v3080_v48 = vpop.permute.xlu0 %373 }
 0x129   :  { %842 = vrot.lane.b32.xlu0 %v809_v63, %s2430_s23  ;;  %869 = vrot.lane.b32.xlu1 %v827_v59, %s2430_s23 }
 0x12b   :  { %v3090_v35 = vpop.permute.xlu1 %479  ;;  %v3092_v2 = vpop.permute.xlu0 %400 }
 0x12d   :  { %897 = vperm.xlu0 %2394, %v891_v29   ;;  %902 = vperm.xlu1 %2395, %v892_v34   ;;  %v4495_v29 = vmov 0.0|0.0  }
 0x12f   :  { %v3100_v50 = vpop.permute.xlu1 %506  ;;  %v3102_v25 = vpop.permute.xlu0 %379 }
 0x131   :  { %912 = vperm.xlu0 %2394, %v894_v15   ;;  %907 = vperm.xlu1 %2395, %v893_v19  }
 0x133   :  { %v3104_v21 = vpop.permute.xlu1 %587  ;;  %v3106_v22 = vpop.permute.xlu0 %406 }
 0x135   :  { %1320 = vrot.lane.b32.xlu0 %v2620_v42, %s2436_s21  ;;  %1294 = vrot.lane.b32.xlu1 %v2620_v42, %s2436_s21 }
 0x137   :  { %v3112_v30 = vpop.permute.xlu1 %614  ;;  %v3114_v31 = vpop.permute.xlu0 %471 }
 0x139   :  { %1326 = vrot.lane.b32.xlu0 %v2620_v42, %s2436_s21  ;;  %1300 = vrot.lane.b32.xlu1 %v2620_v42, %s2436_s21 }
 0x13b   :  { %v3120_v63 = vpop.permute.xlu1 %593  ;;  %v3122_v59 = vpop.permute.xlu0 %498 }
 0x13d   :  { %1384 = vrot.lane.b32.xlu0 %v4495_v29, %s2428_s22  ;;  %1358 = vrot.lane.b32.xlu1 %v4495_v29, %s2428_s22 }
 0x13f   :  { %v3128_v34 = vpop.permute.xlu1 %620  ;;  %v3130_v15 = vpop.permute.xlu0 %477 }
 0x140   :  { %4496 = vst [vmem:[#allocation21_spill] sm:$0xff] %v3128_v34 }
 0x141   :  { %1390 = vrot.lane.b32.xlu0 %v4495_v29, %s2428_s22  ;;  %1364 = vrot.lane.b32.xlu1 %v4495_v29, %s2428_s22 }
 0x143   :  { %v3136_v42 = vpop.permute.xlu0 %504  ;;  %v209_v19 = vpop.permute.xlu1 %208 }
 0x144   :  { %v220_v8 = vsel %vm218_vm9, %v209_v19, %v3031_v36  ;;  %v219_v56 = vsel %vm218_vm9, %v2947_v61, %v209_v19 }
 0x145   :  { %1472 = vrot.lane.b32.xlu0 %v2632_v47, %s2434_s10  ;;  %1446 = vrot.lane.b32.xlu1 %v2632_v47, %s2434_s10 }
 0x146   :  { %952 = vmatprep.subr.bf16.mxu0 %v220_v8 }
 0x147   :  { %953 = vmatpush1.bf16.msra.mxu0 %v219_v56  ;;  %v3146_v9 = vpop.permute.xlu0 %585  ;;  %v236_v29 = vpop.permute.xlu1 %235 }
 0x148   :  { %v246_v34 = vsel %vm218_vm9, %v236_v29, %v3044_v11  ;;  %v245_v36 = vsel %vm218_vm9, %v2945_v60, %v236_v29  ;;  %v285_v60 = vsel %vm283_vm10, %v2616_v40, %v2849_v43 }
 0x149   :  { %1478 = vrot.lane.b32.xlu0 %v2632_v47, %s2434_s10  ;;  %1452 = vrot.lane.b32.xlu1 %v2632_v47, %s2434_s10 }
 0x14a   :  { %1058 = vmatprep.subr.bf16.mxu1 %v246_v34  ;;  %v284_v34 = vsel %vm283_vm10, %v2875_v49, %v2616_v40  ;;  %v286_v40 = vsel %vm283_vm10, %v2932_v38, %v2900_v14 }
 0x14b   :  { %1059 = vmatpush1.bf16.msra.mxu1 %v245_v36  ;;  %v3156_v61 = vpop.permute.xlu0 %612  ;;  %v215_v56 = vpop.permute.xlu1 %214 }
 0x14c   :  { %v222_v8 = vsel %vm218_vm9, %v215_v56, %v3054_v18  ;;  %v221_v11 = vsel %vm218_vm9, %v2953_v6, %v215_v56  ;;  %v4501_v56 = vld [vmem:[#allocation21_spill] sm:$0xff] }
 0x14d   :  { %1560 = vrot.lane.b32.xlu0 %v2649_v51, %s2433_s30  ;;  %1534 = vrot.lane.b32.xlu1 %v2649_v51, %s2433_s30 }
 0x14e   :  { %954 = vmatprep.subr.bf16.mxu0 %v222_v8 }
 0x14f   :  { %955 = vmatpush1.bf16.msra.mxu0 %v221_v11  ;;  %v3166_v47 = vpop.permute.xlu0 %591  ;;  %v242_v29 = vpop.permute.xlu1 %241 }
 0x150   :  { %956 = vmatprep.subr.bf16.mxu0 %v285_v60  ;;  %v248_v6 = vsel %vm218_vm9, %v242_v29, %v3067_v0  ;;  %v247_v18 = vsel %vm218_vm9, %v2951_v10, %v242_v29  ;;  %v287_v0 = vsel %vm283_vm10, %v2900_v14, %v2902_v37  ;;  %v311_v10 = vsel %vm283_vm10, %v2847_v46, %v2865_v44 }
 0x151   :  { %1566 = vrot.lane.b32.xlu0 %v2649_v51, %s2433_s30  ;;  %1540 = vrot.lane.b32.xlu1 %v2649_v51, %s2433_s30  ;;  %v310_v51 = vsel %vm283_vm10, %v2883_v7, %v2847_v46  ;;  %v385_v44 = vsel %vm383_vm8, %v3080_v48, %v3016_v23  ;;  %v313_v37 = vsel %vm283_vm10, %v2917_v62, %v2919_v5 }
 0x152   :  { %1060 = vmatprep.subr.bf16.mxu1 %v248_v6  ;;  %v384_v46 = vsel %vm383_vm8, %v2959_v53, %v3080_v48  ;;  %v312_v7 = vsel %vm283_vm10, %v2934_v52, %v2917_v62  ;;  %v387_v14 = vsel %vm383_vm8, %v3102_v25, %v3042_v1  ;;  %v411_v5 = vsel %vm383_vm8, %v3092_v2, %v3029_v41 }
 0x153   :  { %957 = vmatpush1.bf16.msra.mxu0 %v284_v34  ;;  %1061 = vmatpush1.bf16.msra.mxu1 %v247_v18  ;;  %v3182_v43 = vpop.permute.xlu0 %618  ;;  %v3190_v19 = vpop.permute.xlu1 %616  ;;  %v386_v62 = vsel %vm383_vm8, %v2967_v13, %v3102_v25  ;;  %v410_v52 = vsel %vm383_vm8, %v2961_v57, %v3092_v2  ;;  %v483_v41 = vsel %vm481_vm7, %v3114_v31, %v3065_v26 }
 0x154   :  { %958 = vmatprep.subr.bf16.mxu0 %v287_v0  ;;  %1062 = vmatprep.subr.bf16.mxu1 %v311_v10  ;;  %v413_v1 = vsel %vm383_vm8, %v3106_v22, %v3052_v16  ;;  %v482_v57 = vsel %vm481_vm7, %v2977_v58, %v3114_v31  ;;  %v412_v13 = vsel %vm383_vm8, %v2969_v54, %v3106_v22 }
 0x155   :  { %1642 = vrot.lane.b32.xlu0 %v2781_v4, %s2431_s24  ;;  %v485_v16 = vsel %vm481_vm7, %v3130_v15, %v3090_v35  ;;  %v509_v2 = vsel %vm481_vm7, %v3122_v59, %v3078_v27  ;;  %v484_v54 = vsel %vm481_vm7, %v2989_v39, %v3130_v15  ;;  %v508_v58 = vsel %vm481_vm7, %v2975_v55, %v3122_v59 }
 0x156   :  { %v511_v27 = vsel %vm481_vm7, %v3136_v42, %v3100_v50  ;;  %v510_v39 = vsel %vm481_vm7, %v2987_v12, %v3136_v42  ;;  %v597_v50 = vsel %vm422_vm5, %v3146_v9, %v3104_v21 }
 0x157   :  { %959 = vmatpush1.bf16.msra.mxu0 %v286_v40  ;;  %1063 = vmatpush1.bf16.msra.mxu1 %v310_v51  ;;  %v3200_v49 = vpop.permute.xlu0 %683  ;;  %v3208_v36 = vpop.permute.xlu1 %685 }
 0x158   :  { %960 = vmatprep.subr.bf16.mxu0 %v385_v44  ;;  %1064 = vmatprep.subr.bf16.mxu1 %v313_v37 }
 0x159   :  { %1668 = vrot.lane.b32.xlu0 %v2781_v4, %s2431_s24 }
 0x15b   :  { %961 = vmatpush1.bf16.msra.mxu0 %v384_v46  ;;  %1065 = vmatpush1.bf16.msra.mxu1 %v312_v7  ;;  %v3218_v23 = vpop.permute.xlu0 %710  ;;  %v3226_v38 = vpop.permute.xlu1 %712 }
 0x15c   :  { %962 = vmatprep.subr.bf16.mxu0 %v387_v14  ;;  %1066 = vmatprep.subr.bf16.mxu1 %v411_v5  ;;  %v721_v29 = vsel %vm324_vm4, %v3218_v23, %v3226_v38 }
 0x15d   :  { %1648 = vrot.lane.b32.xlu0 %v2781_v4, %s2431_s24 }
 0x15f   :  { %963 = vmatpush1.bf16.msra.mxu0 %v386_v62  ;;  %1067 = vmatpush1.bf16.msra.mxu1 %v410_v52  ;;  %v682_v53 = vpop.permute.xlu0 %681  ;;  %v3242_v48 = vpop.permute.xlu1 %708  ;;  %v2399_v62 = vld [vmem:[%s4415_s1 + $0x1c] ss:$12 sps:$4 sm:$0xff]  }
 0x160   :  { %964 = vmatprep.subr.bf16.mxu0 %v483_v41  ;;  %1068 = vmatprep.subr.bf16.mxu1 %v413_v1  ;;  %v694_v11 = vsel %vm324_vm4, %v682_v53, %v3200_v49  ;;  %v720_v34 = vsel %vm324_vm4, %v3242_v48, %v3218_v23  ;;  %v2396_v23 = vld [vmem:[%s4415_s1] ss:$12 sps:$4 sm:$0xff]  }
 0x161   :  { %1674 = vrot.lane.b32.xlu0 %v2781_v4, %s2431_s24 }
 0x163   :  { %965 = vmatpush1.bf16.msra.mxu0 %v482_v57  ;;  %1069 = vmatpush1.bf16.msra.mxu1 %v412_v13  ;;  %v690_v26 = vpop.permute.xlu0 %689  ;;  %v692_v4 = vpop.permute.xlu1 %691  ;;  %v2401_v57 = vld [vmem:[%s4415_s1 + $0x18] ss:$12 sps:$4 sm:$0xff]  }
 0x164   :  { %966 = vmatprep.subr.bf16.mxu0 %v485_v16  ;;  %1070 = vmatprep.subr.bf16.mxu1 %v509_v2  ;;  %v697_v60 = vsel %vm324_vm4, %v690_v26, %v692_v4 }
 0x165   :  { %1730 = vrot.lane.b32.xlu0 %v2889_v45, %s2432_s29 }
 0x167   :  { %967 = vmatpush1.bf16.msra.mxu0 %v484_v54  ;;  %1071 = vmatpush1.bf16.msra.mxu1 %v508_v58  ;;  %v717_v35 = vpop.permute.xlu0 %716  ;;  %v719_v25 = vpop.permute.xlu1 %718  ;;  %v4502_v58 = vmov 0  }
 0x168   :  { %1072 = vmatprep.subr.bf16.mxu1 %v511_v27  ;;  %968 = vmatprep.subr.bf16.mxu0 %v2518_v20  ;;  %v723_v10 = vsel %vm324_vm4, %v717_v35, %v719_v25 }
 0x169   :  { %1756 = vrot.lane.b32.xlu0 %v2889_v45, %s2432_s29 }
 0x16b   :  { %969 = vmatpush1.bf16.msra.mxu0 %v2481_v3  ;;  %1073 = vmatpush1.bf16.msra.mxu1 %v510_v39  ;;  %v688_v55 = vpop.permute.xlu0 %687  ;;  %v715_v22 = vpop.permute.xlu1 %714  ;;  %v4497_v3 = vld [vmem:[#allocation18_spill] sm:$0xff] }
 0x16c   :  { %970 = vmatprep.subr.bf16.mxu0 %v2558_v28  ;;  %1074 = vmatprep.subr.bf16.mxu1 %v2536_v24  ;;  %v596_v12 = vsel %vm422_vm5, %v4497_v3, %v3146_v9  ;;  %v4498_v28 = vld [vmem:[#allocation3_spill] sm:$0xff]  ;;  %v4500_v9 = vld [vmem:[#allocation17_spill] sm:$0xff]  ;;  %v696_v18 = vsel %vm324_vm4, %v688_v55, %v690_v26  ;;  %v722_v51 = vsel %vm324_vm4, %v715_v22, %v717_v35 }
 0x16d   :  { %v622_v15 = vsel %vm422_vm5, %v4500_v9, %v3156_v61  ;;  %v2403_v3 = vld [vmem:[%s4415_s1 + $0x20] ss:$12 sps:$4 sm:$0xff]  }
 0x16f   :  { %971 = vmatpush1.bf16.msra.mxu0 %v2579_v32  ;;  %1075 = vmatpush1.bf16.msra.mxu1 %v2501_v17  ;;  %v741_v20 = vpop.permute.xlu0 %740  ;;  %v743_v31 = vpop.permute.xlu1 %742  ;;  %v599_v17 = vsel %vm422_vm5, %v3166_v47, %v3120_v63  ;;  %v623_v32 = vsel %vm422_vm5, %v3156_v61, %v3112_v30  ;;  %v695_v63 = vsel %vm324_vm4, %v3200_v49, %v3208_v36 }
 0x170   :  { %972 = vmatprep.subr.bf16.mxu0 %v597_v50  ;;  %1076 = vmatprep.subr.bf16.mxu1 %v2585_v33  ;;  %v4499_v33 = vld [vmem:[#allocation20_spill] sm:$0xff]  ;;  %v625_v30 = vsel %vm422_vm5, %v3182_v43, %v4501_v56  ;;  %v624_v61 = vsel %vm422_vm5, %v3190_v19, %v3182_v43  ;;  %v752_v0 = vsel %vm750_vm11, %v741_v20, %v743_v31 }
 0x171   :  { %v598_v59 = vsel %vm422_vm5, %v4499_v33, %v3166_v47  ;;  %v2402_v31 = vld [vmem:[%s4415_s1 + $0x8] ss:$12 sps:$4 sm:$0xff]  }
 0x173   :  { %973 = vmatpush1.bf16.msra.mxu0 %v596_v12  ;;  %1077 = vmatpush1.bf16.msra.mxu1 %v4498_v28  ;;  %v768_v24 = vpop.permute.xlu0 %767  ;;  %v770_v21 = vpop.permute.xlu1 %769 }
 0x174   :  { %974 = vmatprep.subr.bf16.mxu0 %v599_v17  ;;  %1078 = vmatprep.subr.bf16.mxu1 %v623_v32  ;;  %v778_v37 = vsel %vm750_vm11, %v768_v24, %v770_v21 }
 0x177   :  { %975 = vmatpush1.bf16.msra.mxu0 %v598_v59  ;;  %1079 = vmatpush1.bf16.msra.mxu1 %v622_v15  ;;  %v739_v42 = vpop.permute.xlu0 %738  ;;  %v766_v8 = vpop.permute.xlu1 %765 }
 0x178   :  { %976 = vmatprep.subr.bf16.mxu0 %v695_v63  ;;  %1080 = vmatprep.subr.bf16.mxu1 %v625_v30  ;;  %v751_v40 = vsel %vm750_vm11, %v739_v42, %v741_v20  ;;  %v777_v7 = vsel %vm750_vm11, %v766_v8, %v768_v24 }
 0x17b   :  { %977 = vmatpush1.bf16.msra.mxu0 %v694_v11  ;;  %1081 = vmatpush1.bf16.msra.mxu1 %v624_v61  ;;  %v747_v47 = vpop.permute.xlu0 %746  ;;  %v749_v6 = vpop.permute.xlu1 %748 }
 0x17c   :  { %978 = vmatprep.subr.bf16.mxu0 %v697_v60  ;;  %1082 = vmatprep.subr.bf16.mxu1 %v721_v29  ;;  %v754_v44 = vsel %vm750_vm11, %v747_v47, %v749_v6 }
 0x17f   :  { %979 = vmatpush1.bf16.msra.mxu0 %v696_v18  ;;  %1083 = vmatpush1.bf16.msra.mxu1 %v720_v34  ;;  %v774_v43 = vpop.permute.xlu0 %773  ;;  %v776_v19 = vpop.permute.xlu1 %775 }
 0x180   :  { %980 = vmatprep.subr.bf16.mxu0 %v752_v0  ;;  %1084 = vmatprep.subr.bf16.mxu1 %v723_v10  ;;  %v780_v5 = vsel %vm750_vm11, %v774_v43, %v776_v19 }
 0x183   :  { %981 = vmatpush1.bf16.msra.mxu0 %v751_v40  ;;  %1085 = vmatpush1.bf16.msra.mxu1 %v722_v51  ;;  %v745_v49 = vpop.permute.xlu0 %744  ;;  %v772_v36 = vpop.permute.xlu1 %771 }
 0x184   :  { %982 = vmatprep.subr.bf16.mxu0 %v754_v44  ;;  %1086 = vmatprep.subr.bf16.mxu1 %v778_v37  ;;  %v753_v46 = vsel %vm750_vm11, %v745_v49, %v747_v47  ;;  %v779_v53 = vsel %vm750_vm11, %v772_v36, %v774_v43 }
 0x187   :  { %983 = vmatpush1.bf16.msra.mxu0 %v753_v46  ;;  %1087 = vmatpush1.bf16.msra.mxu1 %v777_v7  ;;  %v839_v14 = vpop.permute.xlu0 %838  ;;  %v841_v38 = vpop.permute.xlu1 %840 }
 0x188   :  { %1088 = vmatprep.subr.bf16.mxu1 %v780_v5  ;;  %v850_v52 = vsel %vm147_vm6, %v839_v14, %v841_v38  ;;  %v4504_v5 = vld [vmem:[#allocation4_spill] sm:$0xff] }
 0x189   :  { %1005 = vmatprep.subr.bf16.mxu0 %v850_v52 }
 0x18a   :  { %985 = vmatmul.mubr.bf16.vlgmr.msra.gmra.mrb[0].mxu0 %v2396_v23 }
 0x18b   :  { %1089 = vmatpush1.bf16.msra.mxu1 %v779_v53  ;;  %v866_v41 = vpop.permute.xlu0 %865  ;;  %v868_v1 = vpop.permute.xlu1 %867  ;;  %994 = vmatprep.mubr.bf16.mxu0 %v2399_v62 }
 0x18c   :  { %v876_v48 = vsel %vm147_vm6, %v866_v41, %v868_v1 }
 0x18d   :  { %1111 = vmatprep.subr.bf16.mxu1 %v876_v48 }
 0x18e   :  { %1091 = vmatmul.mubr.bf16.vlgmr.msra.gmra.mrb[0].mxu1 %v2396_v23  ;;  %v4503_v23 = vld [vmem:[#allocation10_spill] sm:$0xff] }
 0x18f   :  { %v837_v13 = vpop.permute.xlu0 %836  ;;  %v864_v26 = vpop.permute.xlu1 %863  ;;  %1100 = vmatprep.mubr.bf16.mxu1 %v2399_v62 }
 0x190   :  { %v849_v16 = vsel %vm147_vm6, %v837_v13, %v839_v14  ;;  %v875_v2 = vsel %vm147_vm6, %v864_v26, %v866_v41 }
 0x191   :  { %1006 = vmatpush1.bf16.msra.mxu0 %v849_v16  ;;  %1112 = vmatpush1.bf16.msra.mxu1 %v875_v2 }
 0x192   :  { %995 = vmatmul.mubr.bf16.gmra.mrb[4].mxu0 %v2401_v57 }
 0x193   :  { %v845_v4 = vpop.permute.xlu0 %844  ;;  %v847_v54 = vpop.permute.xlu1 %846  ;;  %1037 = vmatprep.mubr.bf16.mxu0 %v4502_v58 }
 0x194   :  { %v852_v35 = vsel %vm147_vm6, %v845_v4, %v847_v54 }
 0x195   :  { %1007 = vmatprep.subr.bf16.mxu0 %v852_v35 }
 0x196   :  { %1101 = vmatmul.mubr.bf16.gmra.mrb[4].mxu1 %v2401_v57 }
 0x197   :  { %v872_v27 = vpop.permute.xlu0 %871  ;;  %v874_v25 = vpop.permute.xlu1 %873  ;;  %1143 = vmatprep.mubr.bf16.mxu1 %v4502_v58 }
 0x198   :  { %v878_v39 = vsel %vm147_vm6, %v872_v27, %v874_v25 }
 0x199   :  { %1113 = vmatprep.subr.bf16.mxu1 %v878_v39 }
 0x19b   :  { %v843_v55 = vpop.permute.xlu0 %842  ;;  %v870_v22 = vpop.permute.xlu1 %869 }
 0x19c   :  { %v851_v20 = vsel %vm147_vm6, %v843_v55, %v845_v4  ;;  %v877_v50 = vsel %vm147_vm6, %v870_v22, %v872_v27 }
 0x19d   :  { %1008 = vmatpush1.bf16.msra.mxu0 %v851_v20  ;;  %1114 = vmatpush1.bf16.msra.mxu1 %v877_v50 }
 0x1a0   :  { %2267 = vmatmul.mubr.msk.bf16.vlgmr.msra.gmra.mrb[0].mxu0 %vm945_vm12, %v2402_v31  ;;  %2269 = vmatmul.mubr.msk.bf16.vlgmr.msra.gmra.mrb[0].mxu1 %vm945_vm12, %v2402_v31 }
 0x1a1   :  { %1047 = vmatprep.mubr.bf16.mxu0 %v4502_v58  ;;  %1153 = vmatprep.mubr.bf16.mxu1 %v4502_v58 }
 0x1a8   :  { %2268 = vmatmul.mubr.msk.bf16.gmra.mrb[4].mxu0 %vm945_vm12, %v2403_v3  ;;  %2270 = vmatmul.mubr.msk.bf16.gmra.mrb[4].mxu1 %vm945_vm12, %v2403_v3 }
 0x1ac   :  { %v898_v12 = vpop.permute.xlu0 %897  ;;  %v903_v28 = vpop.permute.xlu1 %902 }
 0x1b0   :  { %v908_v51 = vpop.permute.xlu1 %907  ;;  %v913_v27 = vpop.permute.xlu0 %912 }
 0x273   :  { %v1039_v24 = vpop.f32.mrb[0].mxu0  ;;  %v1145_v17 = vpop.f32.mrb[0].mxu1 }
 0x274   :  { %v2289_v32 = vadd.f32 %v1039_v24, %v898_v12  ;;  %v2297_v21 = vadd.f32 %v1145_v17, %v898_v12  ;;  %v1041_v33 = vpop.f32.mrb[1].mxu0  ;;  %v1147_v59 = vpop.f32.mrb[1].mxu1 }
 0x275   :  { %v2290_v9 = vadd.f32 %v1041_v33, %v898_v12  ;;  %v2298_v15 = vadd.f32 %v1147_v59, %v898_v12  ;;  %v1043_v42 = vpop.f32.mrb[2].mxu0  ;;  %v1149_v63 = vpop.f32.mrb[2].mxu1 }
 0x276   :  { %vm1164_vm13 = vcmp.ge.f32.partialorder %v2289_v32, 0.0  ;;  %v1180_v56 = vmul.f32 0.2, %v2289_v32  ;;  %vm1166_vm14 = vcmp.ge.f32.partialorder %v2297_v21, 0.0  ;;  %v1182_v30 = vmul.f32 0.2, %v2297_v21 }
 0x277   :  { %vm1165_vm15 = vcmp.ge.f32.partialorder %v2290_v9, 0.0  ;;  %v1181_v8 = vmul.f32 0.2, %v2290_v9  ;;  %vm1167_vm0 = vcmp.ge.f32.partialorder %v2298_v15, 0.0  ;;  %v1183_v11 = vmul.f32 0.2, %v2298_v15 }
 0x278   :  { %v3360_v61 = vsel %vm1164_vm13, %v2289_v32, %v1180_v56  ;;  %v3362_v47 = vsel %vm1166_vm14, %v2297_v21, %v1182_v30  ;;  %v2291_v60 = vadd.f32 %v1043_v42, %v903_v28  ;;  %v2299_v29 = vadd.f32 %v1149_v63, %v903_v28  ;;  %v1045_v6 = vpop.f32.mrb[3].mxu0  ;;  %v1151_v18 = vpop.f32.mrb[3].mxu1 }
 0x279   :  { %v3364_v34 = vsel %vm1165_vm15, %v2290_v9, %v1181_v8  ;;  %v3366_v43 = vsel %vm1167_vm0, %v2298_v15, %v1183_v11  ;;  %v2292_v0 = vadd.f32 %v1045_v6, %v903_v28  ;;  %v2300_v10 = vadd.f32 %v1151_v18, %v903_v28  ;;  %v4509_v6 = vld [vmem:[#allocation12_spill] sm:$0xff] }
 0x27a   :  { %vm1168_vm1 = vcmp.ge.f32.partialorder %v2291_v60, 0.0  ;;  %v1184_v19 = vmul.f32 0.2, %v2291_v60  ;;  %vm1170_vm2 = vcmp.ge.f32.partialorder %v2299_v29, 0.0  ;;  %v1186_v40 = vmul.f32 0.2, %v2299_v29 }
 0x27b   :  { %vm1169_vm3 = vcmp.ge.f32.partialorder %v2292_v0, 0.0  ;;  %v1185_v49 = vmul.f32 0.2, %v2292_v0  ;;  %vm1171_vm13 = vcmp.ge.f32.partialorder %v2300_v10, 0.0  ;;  %v1187_v44 = vmul.f32 0.2, %v2300_v10 }
 0x27c   :  { %v3368_v37 = vsel %vm1168_vm1, %v2291_v60, %v1184_v19  ;;  %v3370_v36 = vsel %vm1170_vm2, %v2299_v29, %v1186_v40  ;;  %v1049_v46 = vpop.f32.mrb[4].mxu0  ;;  %v1155_v7 = vpop.f32.mrb[4].mxu1  ;;  %v3374_v14 = vmul.f32 %v3360_v61, %v4503_v23  ;;  %v3378_v38 = vmul.f32 %v4504_v5, %v3362_v47  ;;  %v4510_v40 = vld [vmem:[#allocation8_spill] sm:$0xff] }
 0x27d   :  { %v3380_v62 = vsel %vm1169_vm3, %v2292_v0, %v1185_v49  ;;  %v3382_v52 = vsel %vm1171_vm13, %v2300_v10, %v1187_v44  ;;  %v2293_v53 = vadd.f32 %v1049_v46, %v908_v51  ;;  %v2301_v41 = vadd.f32 %v1155_v7, %v908_v51  ;;  %v1051_v1 = vpop.f32.mrb[5].mxu0  ;;  %v1157_v48 = vpop.f32.mrb[5].mxu1  ;;  %v4511_v46 = vld [vmem:[#allocation6_spill] sm:$0xff] }
 0x27e   :  { %v2294_v57 = vadd.f32 %v1051_v1, %v908_v51  ;;  %v2302_v13 = vadd.f32 %v1157_v48, %v908_v51  ;;  %v1053_v26 = vpop.f32.mrb[6].mxu0  ;;  %v1159_v16 = vpop.f32.mrb[6].mxu1  ;;  %v3386_v2 = vpack.c.bf16 %v3368_v37, %v3360_v61  ;;  %v3390_v4 = vpack.c.bf16 %v3380_v62, %v3364_v34 }
 0x27f   :  { %vm1172_vm14 = vcmp.ge.f32.partialorder %v2293_v53, 0.0  ;;  %v1188_v54 = vmul.f32 0.2, %v2293_v53  ;;  %vm1174_vm15 = vcmp.ge.f32.partialorder %v2301_v41, 0.0  ;;  %v1190_v35 = vmul.f32 0.2, %v2301_v41 }
 0x280   :  { %4505 = vst [vmem:[#allocation18_spill] sm:$0xff] %v3386_v2  ;;  %4506 = vst [vmem:[#allocation3_spill] sm:$0xff] %v3390_v4  ;;  %vm1173_vm0 = vcmp.ge.f32.partialorder %v2294_v57, 0.0  ;;  %v1189_v25 = vmul.f32 0.2, %v2294_v57  ;;  %vm1175_vm1 = vcmp.ge.f32.partialorder %v2302_v13, 0.0  ;;  %1360 = vrot.lane.b32.xlu1 %v3386_v2, %s2428_s22  ;;  %1362 = vrot.lane.b32.xlu0 %v3390_v4, %s2428_s22  ;;  %v2295_v20 = vadd.f32 %v1053_v26, %v913_v27 }
 0x281   :  { %v1191_v39 = vmul.f32 0.2, %v2302_v13  ;;  %v3396_v55 = vsel %vm1172_vm14, %v2293_v53, %v1188_v54  ;;  %v3398_v22 = vsel %vm1174_vm15, %v2301_v41, %v1190_v35  ;;  %v2303_v50 = vadd.f32 %v1159_v16, %v913_v27  ;;  %v1055_v31 = vpop.f32.mrb[7].mxu0  ;;  %v1161_v3 = vpop.f32.mrb[7].mxu1  ;;  %v4512_v16 = vld [vmem:[#allocation9_spill] sm:$0xff] }
 0x282   :  { %v3400_v12 = vsel %vm1173_vm0, %v2294_v57, %v1189_v25  ;;  %v2296_v24 = vadd.f32 %v1055_v31, %v913_v27  ;;  %v2304_v17 = vadd.f32 %v1161_v3, %v913_v27  ;;  %vm1176_vm2 = vcmp.ge.f32.partialorder %v2295_v20, 0.0  ;;  %v4513_v27 = vld [vmem:[#allocation5_spill] sm:$0xff] }
 0x283   :  { %v3402_v28 = vsel %vm1175_vm1, %v2302_v13, %v1191_v39  ;;  %v1192_v32 = vmul.f32 0.2, %v2295_v20  ;;  %vm1178_vm3 = vcmp.ge.f32.partialorder %v2303_v50, 0.0  ;;  %v1194_v21 = vmul.f32 0.2, %v2303_v50 }
 0x284   :  { %vm1177_vm13 = vcmp.ge.f32.partialorder %v2296_v24, 0.0  ;;  %v1193_v33 = vmul.f32 0.2, %v2296_v24  ;;  %vm1179_vm14 = vcmp.ge.f32.partialorder %v2304_v17, 0.0  ;;  %v1195_v59 = vmul.f32 0.2, %v2304_v17 }
 0x285   :  { %v3404_v9 = vsel %vm1176_vm2, %v2295_v20, %v1192_v32  ;;  %v3406_v15 = vsel %vm1178_vm3, %v2303_v50, %v1194_v21  ;;  %v3410_v42 = vpack.c.bf16 %v3370_v36, %v3362_v47  ;;  %v3414_v63 = vpack.c.bf16 %v3382_v52, %v3366_v43 }
 0x286   :  { %v3416_v56 = vsel %vm1177_vm13, %v2296_v24, %v1193_v33  ;;  %v3418_v30 = vsel %vm1179_vm14, %v2304_v17, %v1195_v59  ;;  %v1244_v8 = vmul.f32 %v3368_v37, %v4503_v23  ;;  %v1617_v11 = vmul.f32 %v4504_v5, %v3370_v36 }
 0x287   :  { %4507 = vst [vmem:[#allocation20_spill] sm:$0xff] %v3410_v42  ;;  %4508 = vst [vmem:[#allocation17_spill] sm:$0xff] %v3414_v63  ;;  %1386 = vrot.lane.b32.xlu1 %v3410_v42, %s2428_s22  ;;  %1388 = vrot.lane.b32.xlu0 %v3414_v63, %s2428_s22  ;;  %v1271_v60 = vmul.f32 %v3362_v47, %v4503_v23  ;;  %v1274_v29 = vmul.f32 %v3370_v36, %v4503_v23 }
 0x288   :  { %v1702_v18 = vmul.f32 %v4509_v6, %v3362_v47  ;;  %v1253_v0 = vpack.c.bf16 %v1244_v8, %v3374_v14  ;;  %v1626_v10 = vpack.c.bf16 %v1617_v11, %v3378_v38  ;;  %v1705_v19 = vmul.f32 %v4509_v6, %v3370_v36  ;;  %v4514_v11 = vld [vmem:[#allocation7_spill] sm:$0xff] }
 0x289   :  { %v1405_v51 = vmul.f32 %v3360_v61, %v4510_v40  ;;  %v1283_v49 = vpack.c.bf16 %v1274_v29, %v1271_v60  ;;  %v1408_v44 = vmul.f32 %v3368_v37, %v4510_v40  ;;  %v1242_v7 = vmul.f32 %v4511_v46, %v3364_v34 }
 0x28a   :  { %v1245_v53 = vmul.f32 %v4511_v46, %v3380_v62  ;;  %v1714_v41 = vpack.c.bf16 %v1705_v19, %v1702_v18  ;;  %v1423_v14 = vmul.f32 %v3362_v47, %v4510_v40  ;;  %v1426_v38 = vmul.f32 %v3370_v36, %v4510_v40 }
 0x28b   :  { %v1272_v1 = vmul.f32 %v4511_v46, %v3366_v43  ;;  %1296 = vrot.lane.b32.xlu1 %v1253_v0, %s2436_s21  ;;  %1664 = vrot.lane.b32.xlu0 %v1626_v10, %s2431_s24  ;;  %v1417_v48 = vpack.c.bf16 %v1408_v44, %v1405_v51  ;;  %v1275_v13 = vmul.f32 %v4511_v46, %v3382_v52  ;;  %v4515_v44 = vld [vmem:[#allocation11_spill] sm:$0xff] }
 0x28c   :  { %v1254_v57 = vpack.c.bf16 %v1245_v53, %v1242_v7  ;;  %v1435_v26 = vpack.c.bf16 %v1426_v38, %v1423_v14  ;;  %v1493_v54 = vmul.f32 %v3360_v61, %v4512_v16  ;;  %v1496_v35 = vmul.f32 %v3368_v37, %v4512_v16 }
 0x28d   :  { %v1406_v25 = vmul.f32 %v4513_v27, %v3364_v34  ;;  %v1284_v39 = vpack.c.bf16 %v1275_v13, %v1272_v1  ;;  %v1409_v20 = vmul.f32 %v4513_v27, %v3380_v62  ;;  %v3466_v50 = vmul.f32 %v3362_v47, %v4512_v16 }
 0x28e   :  { %v3470_v31 = vmul.f32 %v3370_v36, %v4512_v16  ;;  %v1505_v3 = vpack.c.bf16 %v1496_v35, %v1493_v54  ;;  %v3474_v24 = vmul.f32 %v4513_v27, %v3366_v43  ;;  %v3478_v17 = vmul.f32 %v4513_v27, %v3382_v52 }
 0x28f   :  { %v3482_v32 = vmul.f32 %v4504_v5, %v3360_v61  ;;  %1322 = vrot.lane.b32.xlu1 %v1283_v49, %s2436_s21  ;;  %1752 = vrot.lane.b32.xlu0 %v1714_v41, %s2432_s29  ;;  %v1418_v21 = vpack.c.bf16 %v1409_v20, %v1406_v25  ;;  %v3490_v59 = vmul.f32 %v4504_v5, %v3368_v37 }
 0x290   :  { %v3496_v60 = vmul.f32 %v4514_v11, %v3364_v34  ;;  %v3500_v29 = vmul.f32 %v4514_v11, %v3380_v62  ;;  %v3504_v18 = vmul.f32 %v4509_v6, %v3360_v61  ;;  %v3510_v10 = vmul.f32 %v4509_v6, %v3368_v37 }
 0x291   :  { %v3514_v19 = vmul.f32 %v4514_v11, %v3366_v43  ;;  %v3518_v51 = vmul.f32 %v4514_v11, %v3382_v52  ;;  %v3524_v7 = vmul.f32 %v3364_v34, %v4515_v44  ;;  %v3528_v53 = vmul.f32 %v3380_v62, %v4515_v44 }
 0x292   :  { %v3532_v41 = vpack.c.bf16 %v3416_v56, %v3400_v12  ;;  %v3542_v1 = vmul.f32 %v3366_v43, %v4515_v44  ;;  %v3548_v54 = vmul.f32 %v3382_v52, %v4515_v44  ;;  %v3564_v20 = vmul.f32 %v4504_v5, %v3398_v22 }
 0x293   :  { %1448 = vrot.lane.b32.xlu1 %v1417_v48, %s2434_s10  ;;  %1298 = vrot.lane.b32.xlu0 %v1254_v57, %s2436_s21  ;;  %v3552_v48 = vpack.c.bf16 %v3418_v30, %v3402_v28  ;;  %v4516_v57 = vld [vmem:[#allocation13_spill] sm:$0xff]  ;;  %v3568_v13 = vmul.f32 %v4504_v5, %v3406_v15  ;;  %v3582_v0 = vmul.f32 %v4511_v46, %v3400_v12 }
 0x294   :  { %v3556_v35 = vmul.f32 %v3364_v34, %v4516_v57  ;;  %v3560_v25 = vmul.f32 %v3380_v62, %v4516_v57  ;;  %v3572_v38 = vmul.f32 %v3366_v43, %v4516_v57  ;;  %v3578_v49 = vmul.f32 %v3382_v52, %v4516_v57 }
 0x295   :  { %v3586_v8 = vmul.f32 %v4511_v46, %v3416_v56  ;;  %v3596_v58 = vpack.c.bf16 %v3404_v9, %v3396_v55  ;;  %v3612_v14 = vpack.c.bf16 %v3406_v15, %v3398_v22  ;;  %v3616_v33 = vmul.f32 %v3396_v55, %v4503_v23 }
 0x296   :  { %v3620_v2 = vmul.f32 %v3404_v9, %v4503_v23  ;;  %v3624_v63 = vmul.f32 %v3398_v22, %v4503_v23  ;;  %v3630_v42 = vmul.f32 %v3406_v15, %v4503_v23  ;;  %v3634_v4 = vmul.f32 %v4513_v27, %v3400_v12 }
 0x297   :  { %1474 = vrot.lane.b32.xlu1 %v1435_v26, %s2434_s10  ;;  %1324 = vrot.lane.b32.xlu0 %v1284_v39, %s2436_s21  ;;  %v3604_v26 = vmul.f32 %v4511_v46, %v3402_v28  ;;  %v3608_v39 = vmul.f32 %v4511_v46, %v3418_v30  ;;  %4519 = vst [vmem:[#allocation4_spill] sm:$0xff] %v3612_v14  ;;  %4520 = vst [vmem:[#allocation12_spill] sm:$0xff] %v3616_v33 }
 0x298   :  { %4521 = vst [vmem:[#allocation8_spill] sm:$0xff] %v3634_v4  ;;  %v3638_v45 = vmul.f32 %v4513_v27, %v3416_v56  ;;  %v3646_v46 = vmul.f32 %v3396_v55, %v4510_v40  ;;  %v3650_v23 = vmul.f32 %v3404_v9, %v4510_v40  ;;  %v3668_v33 = vmul.f32 %v3398_v22, %v4510_v40 }
 0x299   :  { %4517 = vst [vmem:[#allocation21_spill] sm:$0xff] %v3604_v26  ;;  %4518 = vst [vmem:[#allocation10_spill] sm:$0xff] %v3608_v39  ;;  %v3672_v26 = vmul.f32 %v3406_v15, %v4510_v40  ;;  %v3676_v39 = vmul.f32 %v4514_v11, %v3400_v12  ;;  %v3686_v14 = vmul.f32 %v3396_v55, %v4512_v16 }
 0x29a   :  { %4522 = vst [vmem:[#allocation6_spill] sm:$0xff] %v3638_v45  ;;  %4523 = vst [vmem:[#allocation9_spill] sm:$0xff] %v3646_v46  ;;  %v3690_v46 = vmul.f32 %v3404_v9, %v4512_v16  ;;  %v4527_v40 = vpack.c.bf16 %v3470_v31, %v3466_v50  ;;  %v4528_v4 = vpack.c.bf16 %v3478_v17, %v3474_v24  ;;  %v3710_v45 = vpop.permute.xlu0 %1320 }
 0x29b   :  { %1536 = vrot.lane.b32.xlu1 %v1505_v3, %s2433_s30  ;;  %1450 = vrot.lane.b32.xlu0 %v1418_v21, %s2434_s10  ;;  %4524 = vst [vmem:[#allocation5_spill] sm:$0xff] %v3650_v23  ;;  %v3658_v3 = vmul.f32 %v4513_v27, %v3402_v28  ;;  %v3662_v21 = vmul.f32 %v4513_v27, %v3418_v30  ;;  %4529 = vst [vmem:[#allocation13_spill] sm:$0xff] %v3710_v45 }
 0x29c   :  { %v3682_v27 = vmul.f32 %v4514_v11, %v3416_v56  ;;  %v3708_v23 = vmul.f32 %v4514_v11, %v3418_v30  ;;  %v3722_v24 = vmul.f32 %v3406_v15, %v4512_v16  ;;  %v3736_v31 = vmul.f32 %v4504_v5, %v3396_v55 }
 0x29d   :  { %4525 = vst [vmem:[#allocation7_spill] sm:$0xff] %v3658_v3  ;;  %4526 = vst [vmem:[#allocation11_spill] sm:$0xff] %v3662_v21  ;;  %v3704_v21 = vmul.f32 %v4514_v11, %v3402_v28  ;;  %v3728_v11 = vmul.f32 %v4509_v6, %v3398_v22  ;;  %v3746_v17 = vmul.f32 %v4509_v6, %v3396_v55 }
 0x29e   :  { %v3750_v3 = vmul.f32 %v4509_v6, %v3404_v9  ;;  %v4532_v45 = vpack.c.bf16 %v3490_v59, %v3482_v32  ;;  %v4533_v50 = vpack.c.bf16 %v3500_v29, %v3496_v60  ;;  %v3776_v59 = vmul.f32 %v3402_v28, %v4515_v44 }
 0x29f   :  { %1562 = vrot.lane.b32.xlu1 %v4527_v40, %s2433_s30  ;;  %1476 = vrot.lane.b32.xlu0 %v4528_v4, %s2434_s10  ;;  %v3718_v4 = vmul.f32 %v3398_v22, %v4512_v16  ;;  %v3732_v40 = vmul.f32 %v4509_v6, %v3406_v15  ;;  %v3742_v16 = vmul.f32 %v4504_v5, %v3404_v9 }
 0x2a0   :  { %4531 = vst [vmem:[#allocation23_spill] sm:$0xff] %v3746_v17  ;;  %v3768_v6 = vmul.f32 %v3416_v56, %v4515_v44  ;;  %4535 = vst [vmem:[#allocation25_spill] sm:$0xff] %v3776_v59  ;;  %v3780_v60 = vmul.f32 %v3418_v30, %v4515_v44  ;;  %v3796_v17 = vpop.permute.xlu0 %1326  ;;  %v3802_v29 = vmul.f32 %v3416_v56, %v4516_v57 }
 0x2a1   :  { %4530 = vst [vmem:[#allocation22_spill] sm:$0xff] %v3718_v4  ;;  %v3764_v4 = vmul.f32 %v3400_v12, %v4515_v44  ;;  %v4539_v44 = vpack.c.bf16 %v3518_v51, %v3514_v19 }
 0x2a3   :  { %1638 = vrot.lane.b32.xlu1 %v4532_v45, %s2431_s24  ;;  %1538 = vrot.lane.b32.xlu0 %v4533_v50, %s2433_s30  ;;  %4534 = vst [vmem:[#allocation24_spill] sm:$0xff] %v3764_v4  ;;  %v4536_v50 = vld [vmem:[#allocation15_spill] sm:$0xff]  ;;  %v3794_v45 = vmul.f32 %v3400_v12, %v4516_v57  ;;  %v4538_v4 = vpack.c.bf16 %v3510_v10, %v3504_v18 }
 0x2a4   :  { %v3786_v5 = vmul.f32 %v4536_v50, %v3362_v47  ;;  %v3790_v32 = vmul.f32 %v4536_v50, %v3370_v36  ;;  %4537 = vst [vmem:[#allocation15_spill] sm:$0xff] %v3796_v17  ;;  %v3806_v47 = vmul.f32 %v3402_v28, %v4516_v57  ;;  %v3810_v36 = vmul.f32 %v3418_v30, %v4516_v57 }
 0x2a5   :  { %v3824_v59 = vmul.f32 %v4536_v50, %v3398_v22  ;;  %v3828_v57 = vmul.f32 %v4536_v50, %v3406_v15  ;;  %v1700_v18 = vpack.c.bf16 %v3802_v29, %v3794_v45  ;;  %v3854_v10 = vmul.f32 %v4536_v50, %v3360_v61 }
 0x2a6   :  { %v1858_v17 = vpack.c.bf16 %v3790_v32, %v3786_v5  ;;  %v4541_v61 = vpack.c.bf16 %v3528_v53, %v3524_v7  ;;  %v4542_v7 = vpack.c.bf16 %v3548_v54, %v3542_v1  ;;  %v4545_v1 = vpack.c.bf16 %v3578_v49, %v3572_v38  ;;  %v4550_v49 = vld [vmem:[#allocation4_spill] sm:$0xff]  ;;  %v4551_v38 = vld [vmem:[#allocation14_spill] sm:$0xff] }
 0x2a7   :  { %1726 = vrot.lane.b32.xlu1 %v4538_v4, %s2432_s29  ;;  %1564 = vrot.lane.b32.xlu0 %v4539_v44, %s2433_s30  ;;  %v4540_v4 = vld [vmem:[#allocation16_spill] sm:$0xff]  ;;  %v4546_v54 = vpack.c.bf16 %v3586_v8, %v3582_v0  ;;  %v4585_v29 = vpack.c.bf16 %v3828_v57, %v3824_v59  ;;  %v4586_v59 = vld [vmem:[#allocation13_spill] sm:$0xff] }
 0x2a8   :  { %v3836_v19 = vmul.f32 %v3364_v34, %v4540_v4  ;;  %v3840_v51 = vmul.f32 %v3380_v62, %v4540_v4  ;;  %v3846_v15 = vmul.f32 %v3366_v43, %v4540_v4  ;;  %v3850_v44 = vmul.f32 %v3382_v52, %v4540_v4  ;;  %v4552_v8 = vld [vmem:[#allocation12_spill] sm:$0xff] }
 0x2a9   :  { %v3860_v62 = vmul.f32 %v4536_v50, %v3368_v37  ;;  %v3864_v22 = vmul.f32 %v3400_v12, %v4540_v4  ;;  %v3868_v43 = vmul.f32 %v3416_v56, %v4540_v4  ;;  %v3880_v52 = vmul.f32 %v3402_v28, %v4540_v4  ;;  %v3886_v56 = vpop.permute.xlu0 %1384 }
 0x2aa   :  { %v1841_v34 = vpack.c.bf16 %v3840_v51, %v3836_v19  ;;  %v1859_v37 = vpack.c.bf16 %v3850_v44, %v3846_v15  ;;  %v3884_v12 = vmul.f32 %v3418_v30, %v4540_v4  ;;  %v3898_v28 = vmul.f32 %v4536_v50, %v3404_v9  ;;  %v4561_v4 = vld [vmem:[#allocation11_spill] sm:$0xff] }
 0x2ab   :  { %1640 = vrot.lane.b32.xlu1 %v4541_v61, %s2431_s24  ;;  %1368 = vrot.lane.b32.xlu0 %v3532_v41, %s2428_s22  ;;  %v3894_v61 = vmul.f32 %v4536_v50, %v3396_v55  ;;  %v4543_v9 = vpack.c.bf16 %v3560_v25, %v3556_v35  ;;  %v4544_v50 = vpack.c.bf16 %v3568_v13, %v3564_v20  ;;  %v4547_v35 = vld [vmem:[#allocation10_spill] sm:$0xff]  ;;  %v4548_v25 = vld [vmem:[#allocation21_spill] sm:$0xff]  ;;  %v4562_v30 = vld [vmem:[#allocation7_spill] sm:$0xff] }
 0x2ac   :  { %v4549_v13 = vpack.c.bf16 %v4547_v35, %v4548_v25  ;;  %v4553_v0 = vpack.c.bf16 %v3620_v2, %v4552_v8  ;;  %v4556_v35 = vld [vmem:[#allocation8_spill] sm:$0xff]  ;;  %v4559_v8 = vld [vmem:[#allocation9_spill] sm:$0xff]  ;;  %v4563_v53 = vpack.c.bf16 %v4561_v4, %v4562_v30  ;;  %v4570_v30 = vpack.c.bf16 %v3732_v40, %v3728_v11 }
 0x2ad   :  { %v3910_v55 = vpop.permute.xlu0 %1390 }
 0x2af   :  { %1666 = vrot.lane.b32.xlu1 %v4542_v7, %s2431_s24  ;;  %1394 = vrot.lane.b32.xlu0 %v3552_v48, %s2428_s22 }
 0x2b1   :  { %v3928_v7 = vpop.permute.xlu0 %1472 }
 0x2b3   :  { %1728 = vrot.lane.b32.xlu1 %v4543_v9, %s2432_s29  ;;  %1670 = vrot.lane.b32.xlu0 %v4544_v50, %s2431_s24  ;;  %v3948_v9 = vpop.permute.xlu1 %1294 }
 0x2b5   :  { %v3936_v20 = vpop.permute.xlu0 %1478 }
 0x2b7   :  { %1754 = vrot.lane.b32.xlu1 %v4545_v1, %s2432_s29  ;;  %1304 = vrot.lane.b32.xlu0 %v4546_v54, %s2436_s21  ;;  %v4554_v1 = vpack.c.bf16 %v3630_v42, %v3624_v63  ;;  %v4555_v54 = vld [vmem:[#allocation6_spill] sm:$0xff]  ;;  %v4564_v42 = vpack.c.bf16 %v3672_v26, %v3668_v33  ;;  %v4565_v63 = vpack.c.bf16 %v3682_v27, %v3676_v39 }
 0x2b8   :  { %v4557_v25 = vpack.c.bf16 %v4555_v54, %v4556_v35  ;;  %v4566_v35 = vpack.c.bf16 %v3690_v46, %v3686_v14  ;;  %v4568_v39 = vld [vmem:[#allocation22_spill] sm:$0xff]  ;;  %v4571_v14 = vpack.c.bf16 %v3742_v16, %v3736_v31  ;;  %v4572_v46 = vmov 0.0|0.0   ;;  %v4575_v31 = vld [vmem:[#allocation3_spill] sm:$0xff]  ;;  %v4576_v16 = vld [vmem:[#allocation20_spill] sm:$0xff] }
 0x2b9   :  { %v3950_v50 = vpop.permute.xlu0 %1560  ;;  %v4569_v27 = vpack.c.bf16 %v3722_v24, %v4568_v39  ;;  %v4573_v24 = vld [vmem:[#allocation23_spill] sm:$0xff] }
 0x2ba   :  { %v4574_v4 = vpack.c.bf16 %v3750_v3, %v4573_v24 }
 0x2bb   :  { %1366 = vrot.lane.b32.xlu1 %v3596_v58, %s2428_s22  ;;  %1330 = vrot.lane.b32.xlu0 %v4549_v13, %s2436_s21  ;;  %v3960_v13 = vpop.permute.xlu1 %1300 }
 0x2bd   :  { %v3962_v2 = vpop.permute.xlu0 %1566 }
 0x2bf   :  { %1392 = vrot.lane.b32.xlu1 %v4550_v49, %s2428_s22  ;;  %1736 = vrot.lane.b32.xlu0 %v4551_v38, %s2432_s29 }
 0x2c1   :  { %v3982_v54 = vpop.permute.xlu0 %1642 }
 0x2c3   :  { %1302 = vrot.lane.b32.xlu1 %v4553_v0, %s2436_s21  ;;  %1762 = vrot.lane.b32.xlu0 %v4551_v38, %s2432_s29  ;;  %v4558_v38 = vld [vmem:[#allocation5_spill] sm:$0xff] }
 0x2c4   :  { %v4560_v0 = vpack.c.bf16 %v4558_v38, %v4559_v8  ;;  %v4578_v8 = vld [vmem:[#allocation18_spill] sm:$0xff] }
 0x2c5   :  { %v3994_v26 = vpop.permute.xlu0 %1668 }
 0x2c7   :  { %1328 = vrot.lane.b32.xlu1 %v4554_v1, %s2436_s21  ;;  %1456 = vrot.lane.b32.xlu0 %v4557_v25, %s2434_s10  ;;  %v3980_v1 = vpop.permute.xlu1 %1358  ;;  %v4577_v25 = vld [vmem:[#allocation17_spill] sm:$0xff] }
 0x2cb   :  { %1454 = vrot.lane.b32.xlu1 %v4560_v0, %s2434_s10  ;;  %1482 = vrot.lane.b32.xlu0 %v4563_v53, %s2434_s10  ;;  %v4567_v53 = vpack.c.bf16 %v3708_v23, %v3704_v21  ;;  %v3992_v33 = vpop.permute.xlu1 %1364  ;;  %v4012_v21 = vpop.permute.xlu0 %1648 }
 0x2cf   :  { %1480 = vrot.lane.b32.xlu1 %v4564_v42, %s2434_s10  ;;  %1544 = vrot.lane.b32.xlu0 %v4565_v63, %s2433_s30  ;;  %v4010_v23 = vpop.permute.xlu1 %1446  ;;  %v4022_v40 = vpop.permute.xlu0 %1674 }
 0x2d3   :  { %1542 = vrot.lane.b32.xlu1 %v4566_v35, %s2433_s30  ;;  %1570 = vrot.lane.b32.xlu0 %v4567_v53, %s2433_s30  ;;  %v4020_v11 = vpop.permute.xlu1 %1452  ;;  %v4034_v38 = vpop.permute.xlu0 %1730  ;;  %v4579_v53 = vld [vmem:[#allocation19_spill] sm:$0xff] }
 0x2d7   :  { %1568 = vrot.lane.b32.xlu1 %v4569_v27, %s2433_s30  ;;  %1758 = vrot.lane.b32.xlu0 %v4570_v30, %s2432_s29  ;;  %v4032_v3 = vpop.permute.xlu1 %1534  ;;  %v4042_v42 = vpop.permute.xlu0 %1756  ;;  %v4580_v27 = vld [vmem:[#allocation24_spill] sm:$0xff] }
 0x2d8   :  { %v4581_v30 = vpack.c.bf16 %v3768_v6, %v4580_v27 }
 0x2db   :  { %1644 = vrot.lane.b32.xlu1 %v4571_v14, %s2431_s24  ;;  %1786 = vrot.lane.b32.xlu0 %v4572_v46, %s2438_s13  ;;  %v4040_v0 = vpop.permute.xlu1 %1540 }
 0x2df   :  { %1732 = vrot.lane.b32.xlu1 %v4574_v4, %s2432_s29  ;;  %1812 = vrot.lane.b32.xlu0 %v4572_v46, %s2438_s13  ;;  %v4582_v4 = vld [vmem:[#allocation25_spill] sm:$0xff] }
 0x2e3   :  { %1784 = vrot.lane.b32.xlu1 %v4575_v31, %s2438_s13  ;;  %1808 = vrot.lane.b32.xlu0 %v4576_v16, %s2438_s13 }
 0x2e7   :  { %1810 = vrot.lane.b32.xlu1 %v4577_v25, %s2438_s13  ;;  %1792 = vrot.lane.b32.xlu0 %v4572_v46, %s2438_s13 }
 0x2eb   :  { %1782 = vrot.lane.b32.xlu1 %v4578_v8, %s2438_s13  ;;  %1818 = vrot.lane.b32.xlu0 %v4572_v46, %s2438_s13 }
 0x2ef   :  { %1790 = vrot.lane.b32.xlu1 %v3532_v41, %s2438_s13  ;;  %1814 = vrot.lane.b32.xlu0 %v4550_v49, %s2438_s13 }
 0x2f2   :  { %v4048_v63 = vpop.permute.xlu1 %1360  ;;  %v1363_v35 = vpop.permute.xlu0 %1362 }
 0x2f3   :  { %1816 = vrot.lane.b32.xlu1 %v3552_v48, %s2438_s13  ;;  %1874 = vrot.lane.b32.xlu0 %v4579_v53, %s2430_s23  ;;  %v4056_v39 = vsel %vm283_vm10, %v4048_v63, %v1363_v35  ;;  %v4583_v35 = vpack.c.bf16 %v3780_v60, %v4582_v4  ;;  %v4584_v60 = vpack.c.bf16 %v3810_v36, %v3806_v47  ;;  %v1925_v36 = vld [vmem:[%s4418_s4 + $0x8] sm:$0xff] }
 0x2f7   :  { %1646 = vrot.lane.b32.xlu1 %v4581_v30, %s2431_s24  ;;  %1900 = vrot.lane.b32.xlu0 %v4579_v53, %s2430_s23 }
 0x2f9   :  { %v4064_v14 = vpop.permute.xlu1 %1386  ;;  %v1389_v46 = vpop.permute.xlu0 %1388 }
 0x2fa   :  { %v4068_v24 = vsel %vm283_vm10, %v4064_v14, %v1389_v46 }
 0x2fb   :  { %1672 = vrot.lane.b32.xlu1 %v4583_v35, %s2431_s24  ;;  %1896 = vrot.lane.b32.xlu0 %v1858_v17, %s2430_s23  ;;  %v2406_v17 = vld [vmem:[%s4417_s3 + $0x4] ss:$12 sps:$4 sm:$0xff]  }
 0x2fc   :  { %2122 = vmatprep.mubr.bf16.mxu1 %v2406_v17  ;;  %2016 = vmatprep.mubr.bf16.mxu0 %v2406_v17  ;;  %v4588_v17 = vpack.c.bf16 %v3868_v43, %v3864_v22  ;;  %v1924_v22 = vld [vmem:[%s4418_s4] sm:$0xff] }
 0x2fd   :  { %v1297_v6 = vpop.permute.xlu1 %1296  ;;  %v4078_v27 = vpop.permute.xlu0 %1664 }
 0x2fe   :  { %v1306_v47 = vsel %vm218_vm9, %v3948_v9, %v1297_v6  ;;  %v1927_v9 = vld [vmem:[%s4418_s4 + $0x18] sm:$0xff] }
 0x2ff   :  { %1734 = vrot.lane.b32.xlu1 %v1700_v18, %s2432_s29  ;;  %1880 = vrot.lane.b32.xlu0 %v4579_v53, %s2430_s23 }
 0x301   :  { %v1323_v30 = vpop.permute.xlu1 %1322  ;;  %v1753_v46 = vpop.permute.xlu0 %1752 }
 0x302   :  { %v1332_v57 = vsel %vm218_vm9, %v4586_v59, %v1323_v30 }
 0x303   :  { %1760 = vrot.lane.b32.xlu1 %v4584_v60, %s2432_s29  ;;  %1906 = vrot.lane.b32.xlu0 %v4579_v53, %s2430_s23 }
 0x305   :  { %v4095_v5 = vpop.permute.xlu1 %1448  ;;  %v1299_v32 = vpop.permute.xlu0 %1298 }
 0x306   :  { %v1307_v45 = vsel %vm218_vm9, %v1297_v6, %v1299_v32 }
 0x307   :  { %1788 = vrot.lane.b32.xlu1 %v3596_v58, %s2438_s13  ;;  %1902 = vrot.lane.b32.xlu0 %v4585_v29, %s2430_s23 }
 0x308   :  { %1984 = vmatprep.subr.bf16.mxu0 %v1307_v45 }
 0x309   :  { %1985 = vmatpush1.bf16.msra.mxu0 %v1306_v47  ;;  %v4109_v18 = vpop.permute.xlu1 %1474  ;;  %v1325_v53 = vpop.permute.xlu0 %1324 }
 0x30a   :  { %v1333_v4 = vsel %vm218_vm9, %v1323_v30, %v1325_v53 }
 0x30b   :  { %1872 = vrot.lane.b32.xlu1 %v1841_v34, %s2430_s23  ;;  %1935 = vperm.xlu0 %2394, %v1925_v36   ;;  %v4587_v34 = vpack.c.bf16 %v3860_v62, %v3854_v10  ;;  %v4590_v62 = vpack.c.bf16 %v3898_v28, %v3894_v61 }
 0x30c   :  { %2090 = vmatprep.subr.bf16.mxu1 %v1333_v4 }
 0x30d   :  { %2091 = vmatpush1.bf16.msra.mxu1 %v1332_v57  ;;  %v4121_v35 = vpop.permute.xlu1 %1536  ;;  %v1451_v6 = vpop.permute.xlu0 %1450 }
 0x30f   :  { %1898 = vrot.lane.b32.xlu1 %v1859_v37, %s2430_s23  ;;  %1945 = vperm.xlu0 %2394, %v1927_v9   ;;  %v4589_v37 = vpack.c.bf16 %v3884_v12, %v3880_v52  ;;  %v1926_v52 = vld [vmem:[%s4418_s4 + $0x10] sm:$0xff] }
 0x311   :  { %v4127_v19 = vpop.permute.xlu1 %1562  ;;  %v4129_v51 = vpop.permute.xlu0 %1476 }
 0x313   :  { %1870 = vrot.lane.b32.xlu1 %v4587_v34, %s2430_s23 }
 0x315   :  { %v4135_v30 = vpop.permute.xlu1 %1638  ;;  %v4137_v60 = vpop.permute.xlu0 %1538 }
 0x317   :  { %1878 = vrot.lane.b32.xlu1 %v4588_v17, %s2430_s23 }
 0x319   :  { %v1727_v15 = vpop.permute.xlu1 %1726  ;;  %v4143_v44 = vpop.permute.xlu0 %1564 }
 0x31b   :  { %1904 = vrot.lane.b32.xlu1 %v4589_v37, %s2430_s23 }
 0x31d   :  { %v4149_v32 = vpop.permute.xlu1 %1640  ;;  %v1369_v10 = vpop.permute.xlu0 %1368 }
 0x31f   :  { %1876 = vrot.lane.b32.xlu1 %v4590_v62, %s2430_s23  ;;  %v4591_v62 = vld [vmem:[#allocation15_spill] sm:$0xff] }
 0x321   :  { %v4158_v43 = vpop.permute.xlu1 %1666  ;;  %v1395_v45 = vpop.permute.xlu0 %1394 }
 0x323   :  { %1930 = vperm.xlu1 %2395, %v1924_v22  }
 0x325   :  { %v4163_v12 = vpop.permute.xlu1 %1728  ;;  %v4165_v29 = vpop.permute.xlu0 %1670 }
 0x326   :  { %v4169_v61 = vsel %vm324_vm4, %v1727_v15, %v4163_v12 }
 0x327   :  { %1940 = vperm.xlu1 %2395, %v1926_v52  }
 0x329   :  { %v1755_v28 = vpop.permute.xlu1 %1754  ;;  %v1305_v47 = vpop.permute.xlu0 %1304 }
 0x32a   :  { %v4172_v36 = vsel %vm324_vm4, %v1753_v46, %v1755_v28  ;;  %v4176_v53 = vsel %vm324_vm4, %v1755_v28, %v4042_v42  ;;  %v1370_v28 = vsel %vm283_vm10, %v3980_v1, %v4048_v63  ;;  %v1459_v1 = vsel %vm383_vm8, %v4095_v5, %v1451_v6 }
 0x32d   :  { %v1367_v4 = vpop.permute.xlu1 %1366  ;;  %v1331_v59 = vpop.permute.xlu0 %1330 }
 0x331   :  { %v1393_v57 = vpop.permute.xlu1 %1392  ;;  %v4178_v9 = vpop.permute.xlu0 %1736 }
 0x332   :  { %v1399_v63 = vsel %vm283_vm10, %v1393_v57, %v1395_v45 }
 0x335   :  { %v1303_v34 = vpop.permute.xlu1 %1302  ;;  %v4180_v17 = vpop.permute.xlu0 %1762 }
 0x336   :  { %v1308_v15 = vsel %vm218_vm9, %v3960_v13, %v1303_v34  ;;  %v1309_v37 = vsel %vm218_vm9, %v1303_v34, %v1305_v47  ;;  %v1373_v13 = vsel %vm283_vm10, %v1367_v4, %v1369_v10  ;;  %v1396_v34 = vsel %vm283_vm10, %v3886_v56, %v4064_v14 }
 0x337   :  { %1986 = vmatprep.subr.bf16.mxu0 %v1309_v37  ;;  %v1398_v56 = vsel %vm283_vm10, %v3910_v55, %v1393_v57  ;;  %v1485_v14 = vsel %vm383_vm8, %v4109_v18, %v4129_v51  ;;  %v1547_v55 = vsel %vm481_vm7, %v4121_v35, %v4137_v60  ;;  %v1573_v60 = vsel %vm481_vm7, %v4127_v19, %v4143_v44 }
 0x338   :  { %1987 = vmatpush1.bf16.msra.mxu0 %v1308_v15  ;;  %v1458_v15 = vsel %vm383_vm8, %v4010_v23, %v4095_v5 }
 0x339   :  { %1988 = vmatprep.subr.bf16.mxu0 %v4056_v39  ;;  %v1329_v46 = vpop.permute.xlu1 %1328  ;;  %v1457_v42 = vpop.permute.xlu0 %1456 }
 0x33a   :  { %v1334_v22 = vsel %vm218_vm9, %v4591_v62, %v1329_v46  ;;  %v1335_v52 = vsel %vm218_vm9, %v1329_v46, %v1331_v59  ;;  %v1372_v59 = vsel %vm283_vm10, %v3992_v33, %v1367_v4  ;;  %v1484_v4 = vsel %vm383_vm8, %v3928_v7, %v4109_v18 }
 0x33b   :  { %2092 = vmatprep.subr.bf16.mxu1 %v1335_v52  ;;  %v1546_v7 = vsel %vm481_vm7, %v4032_v3, %v4121_v35 }
 0x33c   :  { %1989 = vmatpush1.bf16.msra.mxu0 %v1370_v28  ;;  %2093 = vmatpush1.bf16.msra.mxu1 %v1334_v22 }
 0x33d   :  { %1990 = vmatprep.subr.bf16.mxu0 %v1373_v13  ;;  %2094 = vmatprep.subr.bf16.mxu1 %v4068_v24  ;;  %v1455_v39 = vpop.permute.xlu1 %1454  ;;  %v1483_v47 = vpop.permute.xlu0 %1482 }
 0x33e   :  { %v1461_v33 = vsel %vm383_vm8, %v1455_v39, %v1457_v42  ;;  %v1460_v23 = vsel %vm383_vm8, %v4020_v11, %v1455_v39  ;;  %v1572_v42 = vsel %vm481_vm7, %v3950_v50, %v4127_v19 }
 0x340   :  { %1991 = vmatpush1.bf16.msra.mxu0 %v1372_v59  ;;  %2095 = vmatpush1.bf16.msra.mxu1 %v1396_v34 }
 0x341   :  { %1992 = vmatprep.subr.bf16.mxu0 %v1459_v1  ;;  %2096 = vmatprep.subr.bf16.mxu1 %v1399_v63  ;;  %v1481_v10 = vpop.permute.xlu1 %1480  ;;  %v1545_v24 = vpop.permute.xlu0 %1544 }
 0x342   :  { %v1487_v5 = vsel %vm383_vm8, %v1481_v10, %v1483_v47  ;;  %v1486_v11 = vsel %vm383_vm8, %v3936_v20, %v1481_v10  ;;  %v2404_v10 = vld [vmem:[%s4417_s3] ss:$12 sps:$4 sm:$0xff]  }
 0x344   :  { %1993 = vmatpush1.bf16.msra.mxu0 %v1458_v15  ;;  %2097 = vmatpush1.bf16.msra.mxu1 %v1398_v56  ;;  %v2407_v15 = vld [vmem:[%s4417_s3 + $0x1c] ss:$12 sps:$4 sm:$0xff]  }
 0x345   :  { %1994 = vmatprep.subr.bf16.mxu0 %v1461_v33  ;;  %2098 = vmatprep.subr.bf16.mxu1 %v1485_v14  ;;  %v1543_v6 = vpop.permute.xlu1 %1542  ;;  %v1571_v45 = vpop.permute.xlu0 %1570 }
 0x346   :  { %v1549_v18 = vsel %vm481_vm7, %v1543_v6, %v1545_v24  ;;  %v1548_v3 = vsel %vm481_vm7, %v4040_v0, %v1543_v6 }
 0x348   :  { %1995 = vmatpush1.bf16.msra.mxu0 %v1460_v23  ;;  %2099 = vmatpush1.bf16.msra.mxu1 %v1484_v4 }
 0x349   :  { %1996 = vmatprep.subr.bf16.mxu0 %v1547_v55  ;;  %2100 = vmatprep.subr.bf16.mxu1 %v1487_v5  ;;  %v1569_v51 = vpop.permute.xlu1 %1568  ;;  %v4220_v57 = vpop.permute.xlu0 %1758  ;;  %v2409_v55 = vld [vmem:[%s4417_s3 + $0x18] ss:$12 sps:$4 sm:$0xff]  }
 0x34a   :  { %v1575_v20 = vsel %vm481_vm7, %v1569_v51, %v1571_v45  ;;  %v1574_v62 = vsel %vm481_vm7, %v3962_v2, %v1569_v51 }
 0x34c   :  { %1997 = vmatpush1.bf16.msra.mxu0 %v1546_v7  ;;  %2101 = vmatpush1.bf16.msra.mxu1 %v1486_v11 }
 0x34d   :  { %1998 = vmatprep.subr.bf16.mxu0 %v1549_v18  ;;  %2102 = vmatprep.subr.bf16.mxu1 %v1573_v60  ;;  %v1645_v37 = vpop.permute.xlu1 %1644  ;;  %v1787_v46 = vpop.permute.xlu0 %1786 }
 0x350   :  { %1999 = vmatpush1.bf16.msra.mxu0 %v1548_v3  ;;  %2103 = vmatpush1.bf16.msra.mxu1 %v1572_v42 }
 0x351   :  { %2000 = vmatprep.subr.bf16.mxu0 %v4575_v31  ;;  %2104 = vmatprep.subr.bf16.mxu1 %v1575_v20  ;;  %v1733_v35 = vpop.permute.xlu1 %1732  ;;  %v1813_v44 = vpop.permute.xlu0 %1812  ;;  %v1651_v31 = vsel %vm422_vm5, %v4149_v32, %v3982_v54  ;;  %v1676_v54 = vsel %vm422_vm5, %v4078_v27, %v4158_v43  ;;  %v2411_v20 = vld [vmem:[%s4417_s3 + $0x20] ss:$12 sps:$4 sm:$0xff]  }
 0x354   :  { %2001 = vmatpush1.bf16.msra.mxu0 %v4578_v8  ;;  %2105 = vmatpush1.bf16.msra.mxu1 %v1574_v62 }
 0x355   :  { %2002 = vmatprep.subr.bf16.mxu0 %v3532_v41  ;;  %2106 = vmatprep.subr.bf16.mxu1 %v4577_v25  ;;  %v1785_v50 = vpop.permute.xlu1 %1784  ;;  %v1809_v0 = vpop.permute.xlu0 %1808  ;;  %v1650_v41 = vsel %vm422_vm5, %v4135_v30, %v4149_v32 }
 0x358   :  { %2003 = vmatpush1.bf16.msra.mxu0 %v3596_v58  ;;  %2107 = vmatpush1.bf16.msra.mxu1 %v4576_v16  ;;  %v1677_v58 = vsel %vm422_vm5, %v4158_v43, %v3994_v26  ;;  %v1739_v26 = vsel %vm324_vm4, %v4163_v12, %v4034_v38  ;;  %v1795_v12 = vsel %vm750_vm11, %v1785_v50, %v1787_v46  ;;  %v2410_v46 = vld [vmem:[%s4417_s3 + $0x8] ss:$12 sps:$4 sm:$0xff]  }
 0x359   :  { %2004 = vmatprep.subr.bf16.mxu0 %v1651_v31  ;;  %2108 = vmatprep.subr.bf16.mxu1 %v3552_v48  ;;  %v1811_v2 = vpop.permute.xlu1 %1810  ;;  %v1793_v16 = vpop.permute.xlu0 %1792 }
 0x35a   :  { %v1820_v59 = vsel %vm750_vm11, %v1809_v0, %v1811_v2 }
 0x35c   :  { %2005 = vmatpush1.bf16.msra.mxu0 %v1650_v41  ;;  %2109 = vmatpush1.bf16.msra.mxu1 %v4550_v49 }
 0x35d   :  { %2110 = vmatprep.subr.bf16.mxu1 %v1677_v58  ;;  %v1783_v25 = vpop.permute.xlu1 %1782  ;;  %v1819_v8 = vpop.permute.xlu0 %1818 }
 0x35e   :  { %v1794_v39 = vsel %vm750_vm11, %v1783_v25, %v1785_v50 }
 0x360   :  { %2111 = vmatpush1.bf16.msra.mxu1 %v1676_v54 }
 0x361   :  { %v1791_v48 = vpop.permute.xlu1 %1790  ;;  %v1815_v22 = vpop.permute.xlu0 %1814 }
 0x365   :  { %v1817_v19 = vpop.permute.xlu1 %1816  ;;  %v1875_v28 = vpop.permute.xlu0 %1874 }
 0x366   :  { %v1822_v56 = vsel %vm750_vm11, %v1815_v22, %v1817_v19  ;;  %v2412_v22 = vld [vmem:[%s4414_s0 + $0x40] sm:$0xff] }
 0x369   :  { %v1647_v30 = vpop.permute.xlu1 %1646 }
 0x36a   :  { %v1652_v32 = vsel %vm422_vm5, %v1645_v37, %v1647_v30  ;;  %v1653_v49 = vsel %vm422_vm5, %v1647_v30, %v4012_v21 }
 0x36b   :  { %2006 = vmatprep.subr.bf16.mxu0 %v1653_v49 }
 0x36c   :  { %2007 = vmatpush1.bf16.msra.mxu0 %v1652_v32 }
 0x36d   :  { %2008 = vmatprep.subr.bf16.mxu0 %v1739_v26  ;;  %v1673_v52 = vpop.permute.xlu1 %1672 }
 0x36e   :  { %v1678_v27 = vsel %vm422_vm5, %v4165_v29, %v1673_v52  ;;  %v1679_v43 = vsel %vm422_vm5, %v1673_v52, %v4022_v40  ;;  %v1901_v40 = vpop.permute.xlu0 %1900  ;;  %v2413_v52 = vld [vmem:[%s4414_s0 + $0x48] sm:$0xff] }
 0x36f   :  { %2112 = vmatprep.subr.bf16.mxu1 %v1679_v43 }
 0x370   :  { %2009 = vmatpush1.bf16.msra.mxu0 %v4169_v61  ;;  %2113 = vmatpush1.bf16.msra.mxu1 %v1678_v27 }
 0x371   :  { %2114 = vmatprep.subr.bf16.mxu1 %v4176_v53  ;;  %v1735_v21 = vpop.permute.xlu1 %1734 }
 0x372   :  { %v1740_v13 = vsel %vm324_vm4, %v1733_v35, %v1735_v21  ;;  %v1741_v38 = vsel %vm324_vm4, %v1735_v21, %v4178_v9  ;;  %v1797_v9 = vsel %vm750_vm11, %v1791_v48, %v1793_v16  ;;  %v1897_v1 = vpop.permute.xlu0 %1896 }
 0x373   :  { %2010 = vmatprep.subr.bf16.mxu0 %v1741_v38  ;;  %v2414_v38 = vld [vmem:[%s4414_s0 + $0x50] sm:$0xff] }
 0x374   :  { %2011 = vmatpush1.bf16.msra.mxu0 %v1740_v13  ;;  %2115 = vmatpush1.bf16.msra.mxu1 %v4172_v36  ;;  %v1821_v36 = vsel %vm750_vm11, %v1811_v2, %v1813_v44 }
 0x375   :  { %2012 = vmatprep.subr.bf16.mxu0 %v1795_v12  ;;  %v1761_v29 = vpop.permute.xlu1 %1760 }
 0x376   :  { %v1766_v61 = vsel %vm324_vm4, %v4220_v57, %v1761_v29  ;;  %v1767_v53 = vsel %vm324_vm4, %v1761_v29, %v4180_v17  ;;  %v1823_v17 = vsel %vm750_vm11, %v1817_v19, %v1819_v8  ;;  %v1881_v33 = vpop.permute.xlu0 %1880  ;;  %v4592_v57 = vmov 0  }
 0x377   :  { %2116 = vmatprep.subr.bf16.mxu1 %v1767_v53  ;;  %v2415_v53 = vld [vmem:[%s4414_s0] sm:$0xff] }
 0x378   :  { %2013 = vmatpush1.bf16.msra.mxu0 %v1794_v39  ;;  %2117 = vmatpush1.bf16.msra.mxu1 %v1766_v61 }
 0x379   :  { %2014 = vmatprep.subr.bf16.mxu0 %v1797_v9  ;;  %2118 = vmatprep.subr.bf16.mxu1 %v1821_v36  ;;  %v1789_v47 = vpop.permute.xlu1 %1788  ;;  %v2416_v9 = vld [vmem:[%s4414_s0 + $0x58] sm:$0xff] }
 0x37a   :  { %v1796_v34 = vsel %vm750_vm11, %v1789_v47, %v1791_v48  ;;  %v1907_v5 = vpop.permute.xlu0 %1906 }
 0x37c   :  { %2015 = vmatpush1.bf16.msra.mxu0 %v1796_v34  ;;  %2119 = vmatpush1.bf16.msra.mxu1 %v1820_v59  ;;  %v2417_v59 = vld [vmem:[%s4414_s0 + $0x8] sm:$0xff] }
 0x37d   :  { %2120 = vmatprep.subr.bf16.mxu1 %v1823_v17  ;;  %v1873_v63 = vpop.permute.xlu1 %1872 }
 0x37e   :  { %v1883_v24 = vsel %vm147_vm6, %v1873_v63, %v1875_v28  ;;  %v1903_v11 = vpop.permute.xlu0 %1902 }
 0x37f   :  { %2037 = vmatprep.subr.bf16.mxu0 %v1883_v24  ;;  %2017 = vmatmul.mubr.bf16.vlgmr.msra.gmra.mrb[8].mxu0 %v2404_v10 }
 0x380   :  { %2121 = vmatpush1.bf16.msra.mxu1 %v1822_v56  ;;  %2026 = vmatprep.mubr.bf16.mxu0 %v2407_v15 }
 0x381   :  { %v1899_v14 = vpop.permute.xlu1 %1898 }
 0x382   :  { %v1908_v6 = vsel %vm147_vm6, %v1897_v1, %v1899_v14  ;;  %v1909_v45 = vsel %vm147_vm6, %v1899_v14, %v1901_v40 }
 0x383   :  { %2123 = vmatmul.mubr.bf16.vlgmr.msra.gmra.mrb[8].mxu1 %v2404_v10  ;;  %2143 = vmatprep.subr.bf16.mxu1 %v1909_v45 }
 0x384   :  { %2144 = vmatpush1.bf16.msra.mxu1 %v1908_v6  ;;  %2132 = vmatprep.mubr.bf16.mxu1 %v2407_v15  ;;  %v2418_v15 = vld [vmem:[%s4414_s0 + $0x10] sm:$0xff]  ;;  %v2419_v6 = vld [vmem:[%s4414_s0 + $0x18] sm:$0xff] }
 0x385   :  { %v1871_v4 = vpop.permute.xlu1 %1870 }
 0x386   :  { %v1882_v23 = vsel %vm147_vm6, %v1871_v4, %v1873_v63 }
 0x387   :  { %2038 = vmatpush1.bf16.msra.mxu0 %v1882_v23 }
 0x388   :  { %2027 = vmatmul.mubr.bf16.gmra.mrb[12].mxu0 %v2409_v55 }
 0x389   :  { %v1879_v51 = vpop.permute.xlu1 %1878  ;;  %2069 = vmatprep.mubr.bf16.mxu0 %v4592_v57 }
 0x38a   :  { %v1885_v7 = vsel %vm147_vm6, %v1879_v51, %v1881_v33  ;;  %v1936_v0 = vpop.permute.xlu0 %1935 }
 0x38b   :  { %2039 = vmatprep.subr.bf16.mxu0 %v1885_v7  ;;  %2133 = vmatmul.mubr.bf16.gmra.mrb[12].mxu1 %v2409_v55 }
 0x38c   :  { %2175 = vmatprep.mubr.bf16.mxu1 %v4592_v57 }
 0x38d   :  { %v1905_v18 = vpop.permute.xlu1 %1904 }
 0x38e   :  { %v1910_v60 = vsel %vm147_vm6, %v1903_v11, %v1905_v18  ;;  %v1911_v37 = vsel %vm147_vm6, %v1905_v18, %v1907_v5  ;;  %v1946_v24 = vpop.permute.xlu0 %1945  ;;  %v2420_v18 = vld [vmem:[%s4414_s0 + $0x60] sm:$0xff] }
 0x38f   :  { %2145 = vmatprep.subr.bf16.mxu1 %v1911_v37 }
 0x390   :  { %2146 = vmatpush1.bf16.msra.mxu1 %v1910_v60 }
 0x391   :  { %v1877_v42 = vpop.permute.xlu1 %1876 }
 0x392   :  { %v1884_v3 = vsel %vm147_vm6, %v1877_v42, %v1879_v51 }
 0x393   :  { %2040 = vmatpush1.bf16.msra.mxu0 %v1884_v3  ;;  %2279 = vmatmul.mubr.msk.bf16.vlgmr.msra.gmra.mrb[8].mxu1 %vm945_vm12, %v2410_v46  ;;  %v2421_v3 = vld [vmem:[%s4414_s0 + $0x68] sm:$0xff] }
 0x394   :  { %2185 = vmatprep.mubr.bf16.mxu1 %v4592_v57 }
 0x396   :  { %2277 = vmatmul.mubr.msk.bf16.vlgmr.msra.gmra.mrb[8].mxu0 %vm945_vm12, %v2410_v46 }
 0x397   :  { %2079 = vmatprep.mubr.bf16.mxu0 %v4592_v57 }
 0x39b   :  { %2280 = vmatmul.mubr.msk.bf16.gmra.mrb[12].mxu1 %vm945_vm12, %v2411_v20 }
 0x39e   :  { %2278 = vmatmul.mubr.msk.bf16.gmra.mrb[12].mxu0 %vm945_vm12, %v2411_v20 }
 0x3a2   :  { %v1931_v35 = vpop.permute.xlu1 %1930 }
 0x3a6   :  { %v1941_v61 = vpop.permute.xlu1 %1940 }
 0x466   :  { %v2177_v44 = vpop.f32.mrb[8].mxu1 }
 0x467   :  { %v2313_v62 = vadd.f32 %v2177_v44, %v1931_v35  ;;  %v2179_v50 = vpop.f32.mrb[9].mxu1 }
 0x468   :  { %v2314_v31 = vadd.f32 %v2179_v50, %v1931_v35  ;;  %v2181_v2 = vpop.f32.mrb[10].mxu1 }
 0x469   :  { %v2220_v41 = vmul.f32 0.2, %v2313_v62  ;;  %v2315_v58 = vadd.f32 %v2181_v2, %v1936_v0  ;;  %v2071_v16 = vpop.f32.mrb[8].mxu0  ;;  %v2183_v25 = vpop.f32.mrb[11].mxu1 }
 0x46a   :  { %v2221_v54 = vmul.f32 0.2, %v2314_v31  ;;  %v2305_v48 = vadd.f32 %v2071_v16, %v1931_v35  ;;  %v2316_v8 = vadd.f32 %v2183_v25, %v1936_v0  ;;  %v2073_v19 = vpop.f32.mrb[9].mxu0  ;;  %v2424_v25 = vld [vmem:[%s4414_s0 + $0x78] sm:$0xff] }
 0x46b   :  { %v2228_v30 = vadd.f32 %v2412_v22, %v2220_v41  ;;  %v2222_v32 = vmul.f32 0.2, %v2315_v58  ;;  %v2306_v49 = vadd.f32 %v2073_v19, %v1931_v35  ;;  %v2075_v26 = vpop.f32.mrb[10].mxu0  ;;  %v2423_v58 = vld [vmem:[%s4414_s0 + $0x20] sm:$0xff] }
 0x46c   :  { %v2229_v27 = vadd.f32 %v2413_v52, %v2221_v54  ;;  %v2196_v43 = vmul.f32 0.2, %v2305_v48  ;;  %v2223_v28 = vmul.f32 0.2, %v2316_v8  ;;  %v2307_v21 = vadd.f32 %v2075_v26, %v1936_v0  ;;  %v2077_v13 = vpop.f32.mrb[11].mxu0  ;;  %v2425_v8 = vld [vmem:[%s4414_s0 + $0x28] sm:$0xff] }
 0x46d   :  { %2281 = vst [vmem:[%s4419_s5 + $0x40] sm:$0xff] %v2228_v30  ;;  %v2230_v12 = vadd.f32 %v2414_v38, %v2222_v32  ;;  %v2197_v40 = vmul.f32 0.2, %v2306_v49  ;;  %v2308_v29 = vadd.f32 %v2077_v13, %v1936_v0  ;;  %v2422_v0 = vld [vmem:[%s4414_s0 + $0x70] sm:$0xff]  ;;  %v2427_v49 = vld [vmem:[%s4414_s0 + $0x38] sm:$0xff] }
 0x46e   :  { %2282 = vst [vmem:[%s4419_s5 + $0x48] sm:$0xff] %v2229_v27  ;;  %v2204_v39 = vadd.f32 %v2415_v53, %v2196_v43  ;;  %v2231_v36 = vadd.f32 %v2416_v9, %v2223_v28  ;;  %v2198_v47 = vmul.f32 0.2, %v2307_v21  ;;  %v2187_v34 = vpop.f32.mrb[12].mxu1  ;;  %v2426_v30 = vld [vmem:[%s4414_s0 + $0x30] sm:$0xff] }
 0x46f   :  { %2283 = vst [vmem:[%s4419_s5 + $0x50] sm:$0xff] %v2230_v12  ;;  %v2205_v1 = vadd.f32 %v2417_v59, %v2197_v40  ;;  %v2199_v17 = vmul.f32 0.2, %v2308_v29  ;;  %v2317_v63 = vadd.f32 %v2187_v34, %v1941_v61  ;;  %v2189_v10 = vpop.f32.mrb[13].mxu1 }
 0x470   :  { %2212 = vst [vmem:[%s4419_s5] sm:$0xff] %v2204_v39  ;;  %2284 = vst [vmem:[%s4419_s5 + $0x58] sm:$0xff] %v2231_v36  ;;  %v2206_v56 = vadd.f32 %v2418_v15, %v2198_v47  ;;  %v2318_v33 = vadd.f32 %v2189_v10, %v1941_v61  ;;  %v2191_v14 = vpop.f32.mrb[14].mxu1 }
 0x471   :  { %2213 = vst [vmem:[%s4419_s5 + $0x8] sm:$0xff] %v2205_v1  ;;  %v2207_v45 = vadd.f32 %v2419_v6, %v2199_v17  ;;  %v2224_v4 = vmul.f32 0.2, %v2317_v63  ;;  %v2319_v23 = vadd.f32 %v2191_v14, %v1946_v24  ;;  %v2081_v55 = vpop.f32.mrb[12].mxu0  ;;  %v2193_v5 = vpop.f32.mrb[15].mxu1 }
 0x472   :  { %2214 = vst [vmem:[%s4419_s5 + $0x10] sm:$0xff] %v2206_v56  ;;  %v2225_v51 = vmul.f32 0.2, %v2318_v33  ;;  %v2309_v57 = vadd.f32 %v2081_v55, %v1941_v61  ;;  %v2320_v7 = vadd.f32 %v2193_v5, %v1946_v24  ;;  %v2083_v11 = vpop.f32.mrb[13].mxu0 }
 0x473   :  { %2215 = vst [vmem:[%s4419_s5 + $0x18] sm:$0xff] %v2207_v45  ;;  %v2232_v60 = vadd.f32 %v2420_v18, %v2224_v4  ;;  %v2226_v37 = vmul.f32 0.2, %v2319_v23  ;;  %v2310_v46 = vadd.f32 %v2083_v11, %v1941_v61  ;;  %v2085_v42 = vpop.f32.mrb[14].mxu0 }
 0x474   :  { %v2233_v20 = vadd.f32 %v2421_v3, %v2225_v51  ;;  %v2200_v35 = vmul.f32 0.2, %v2309_v57  ;;  %v2227_v44 = vmul.f32 0.2, %v2320_v7  ;;  %v2311_v62 = vadd.f32 %v2085_v42, %v1946_v24  ;;  %v2087_v50 = vpop.f32.mrb[15].mxu0 }
 0x475   :  { %2285 = vst [vmem:[%s4419_s5 + $0x60] sm:$0xff] %v2232_v60  ;;  %v2234_v31 = vadd.f32 %v2422_v0, %v2226_v37  ;;  %v2201_v2 = vmul.f32 0.2, %v2310_v46  ;;  %v2312_v41 = vadd.f32 %v2087_v50, %v1946_v24 }
 0x476   :  { %2286 = vst [vmem:[%s4419_s5 + $0x68] sm:$0xff] %v2233_v20  ;;  %v2208_v16 = vadd.f32 %v2423_v58, %v2200_v35  ;;  %v2235_v54 = vadd.f32 %v2424_v25, %v2227_v44  ;;  %v2202_v48 = vmul.f32 0.2, %v2311_v62 }
 0x477   :  { %2287 = vst [vmem:[%s4419_s5 + $0x70] sm:$0xff] %v2234_v31  ;;  %v2209_v19 = vadd.f32 %v2425_v8, %v2201_v2  ;;  %v2203_v22 = vmul.f32 0.2, %v2312_v41 }
 0x478   :  { %2216 = vst [vmem:[%s4419_s5 + $0x20] sm:$0xff] %v2208_v16  ;;  %2288 = vst [vmem:[%s4419_s5 + $0x78] sm:$0xff] %v2235_v54  ;;  %v2210_v32 = vadd.f32 %v2426_v30, %v2202_v48 }
 0x479   :  { %2217 = vst [vmem:[%s4419_s5 + $0x28] sm:$0xff] %v2209_v19  ;;  %v2211_v26 = vadd.f32 %v2427_v49, %v2203_v22 }
 0x47a   :  { %2218 = vst [vmem:[%s4419_s5 + $0x30] sm:$0xff] %v2210_v32 }
 0x47b   :  { %2219 = vst [vmem:[%s4419_s5 + $0x38] sm:$0xff] %v2211_v26 }

</bundles_post_ra>
